<compile_context>
chip_gen: v7x
topology: tpu7x:2x2x1
jax: 0.10.0
libtpu: 0.0.40
codegen_flags: <defaults>
</compile_context>

<pallas_src>
import functools
import math

import jax
import jax.numpy as jnp
from jax import lax
from jax.experimental import pallas as pl
from jax.experimental.pallas import tpu as pltpu


# ----------------------------------------------------------------------------
# Single fused kernel: runs one Encoder layer per grid step along axis 1,
# carrying the activation in VMEM scratch across layers.
# ----------------------------------------------------------------------------
def _transformer_kernel(x_ref, mask_ref, wqkv_ref, bqkv_ref, wo_ref, bo_ref,
                        g1_ref, be1_ref, w1_ref, b1_ref, w2_ref, b2_ref,
                        g2_ref, be2_ref, o_ref, act_ref, ctx_ref, *,
                        batch, seq, heads_num, size_head, kernel_size):
    l = pl.program_id(1)
    n_layers = pl.num_programs(1)

    # Load the input activation into the resident VMEM scratch at layer 0.
    @pl.when(l == 0)
    def _():
        act_ref[...] = x_ref[0]

    x = act_ref[...]                                   # (B*S, D) f32
    BS, D = x.shape
    HDh = heads_num * size_head
    mask = mask_ref[0]                                 # (B, 1, S) additive

    # ---- fused QKV projection: one bf16 matmul (D -> 3*H*Dh) ----
    x_bf = x.astype(jnp.bfloat16)
    qkv = jnp.dot(x_bf, wqkv_ref[0],
                  preferred_element_type=jnp.float32) + bqkv_ref[0]   # (B*S,3HDh)

    # ---- per-head attention, batched over B (no k.T, no lane concat) ----
    # NOTE: a fully-masked query row (all keys ~ -1e9) yields a ~0 softmax
    # denominator and Inf/NaN — same behavior as the PyTorch reference.
    for h in range(heads_num):
        q = qkv[:, h * size_head:(h + 1) * size_head]              # pre-scaled
        k = qkv[:, HDh + h * size_head: HDh + (h + 1) * size_head]
        v = qkv[:, 2 * HDh + h * size_head: 2 * HDh + (h + 1) * size_head]
        q = q.reshape(batch, seq, size_head)
        k = k.reshape(batch, seq, size_head)
        v = v.reshape(batch, seq, size_head)

        s = lax.dot_general(q.astype(jnp.bfloat16), k.astype(jnp.bfloat16),
                            dimension_numbers=(((2,), (2,)), ((0,), (0,))),
                            preferred_element_type=jnp.float32)     # (B,S,S)
        s = s + mask                                                 # (B,1,S)
        m = jnp.max(s, axis=-1, keepdims=True)
        p = jnp.exp(s - m)
        inv = pl.reciprocal(jnp.sum(p, axis=-1, keepdims=True), approx=True)
        p = p * inv
        ctx_h = lax.dot_general(p.astype(jnp.bfloat16), v.astype(jnp.bfloat16),
                                dimension_numbers=(((2,), (1,)), ((0,), (0,))),
                                preferred_element_type=jnp.float32)  # (B,S,Dh)
        ctx_ref[:, h * size_head:(h + 1) * size_head] = (
            ctx_h.reshape(batch * seq, size_head))

    # ---- single output projection (H*Dh -> D) ----
    attn = jnp.dot(ctx_ref[...].astype(jnp.bfloat16), wo_ref[0],
                   preferred_element_type=jnp.float32) + bo_ref[0]   # (B*S, D)

    # ---- residual + LayerNorm 1 (f32; dropout -> identity in eval) ----
    y = x + attn
    mu = jnp.mean(y, axis=-1, keepdims=True)
    var = jnp.mean((y - mu) ** 2, axis=-1, keepdims=True)
    y = (y - mu) * lax.rsqrt(var + 1e-5) * g1_ref[0] + be1_ref[0]

    # ---- InterLayer: Conv1d('same') as ONE im2col matmul + ReLU + 1x1 conv.
    #      Shifted copies built with pltpu.roll on the flattened row axis;
    #      edge masking uses the within-batch position so padding never leaks
    #      across batch boundaries. ----
    pad = (kernel_size - 1) // 2
    row = lax.broadcasted_iota(jnp.int32, (BS, 1), 0)
    s_in_batch = row % seq
    parts = []
    for dk in range(kernel_size):
        shift = pad - dk                      # xs[s] = y[s + dk - pad]
        if shift == 0:
            parts.append(y)
        else:
            xs = pltpu.roll(y, shift=shift % BS, axis=0)     # XLU rotate (f32)
            valid = jnp.logical_and(s_in_batch >= shift,
                                    s_in_batch < seq + shift)
            parts.append(jnp.where(valid, xs, 0.0))
    im2col = jnp.concatenate(parts, axis=-1)                  # (B*S, K*D)
    h_act = jnp.maximum(
        jnp.dot(im2col.astype(jnp.bfloat16), w1_ref[0],
                preferred_element_type=jnp.float32) + b1_ref[0], 0.0)
    z = jnp.dot(h_act.astype(jnp.bfloat16), w2_ref[0],
                preferred_element_type=jnp.float32) + b2_ref[0]      # 1x1 conv

    # ---- residual + LayerNorm 2 ----
    y2 = y + z
    mu2 = jnp.mean(y2, axis=-1, keepdims=True)
    var2 = jnp.mean((y2 - mu2) ** 2, axis=-1, keepdims=True)
    out = (y2 - mu2) * lax.rsqrt(var2 + 1e-5) * g2_ref[0] + be2_ref[0]

    # Carry to the next layer; store to HBM only once, after the last layer.
    act_ref[...] = out

    @pl.when(l == n_layers - 1)
    def _():
        o_ref[0] = out


# ----------------------------------------------------------------------------
# Wrapper: ONE pallas_call for the whole Transformer stack.
# grid = (batch_splits, n_layers): layer axis is "arbitrary" (sequential,
# activation carried in scratch); batch_splits axis is "parallel" (set to 2
# on v7x to occupy both TensorCores, 1 on single-TC chips).
# ----------------------------------------------------------------------------
def transformer_forward(x, attention_mask, fp, *, n_layers, heads_num,
                        size_head, kernel_size, batch_splits=1):
    B, S, D = x.shape
    assert B % batch_splits == 0
    Bs = B // batch_splits
    HDh = heads_num * size_head
    K = kernel_size
    inter = fp["w1"].shape[-1]

    x_flat = x.reshape(batch_splits, Bs * S, D)
    mask4 = attention_mask.reshape(batch_splits, Bs, 1, S)

    kern = functools.partial(_transformer_kernel, batch=Bs, seq=S,
                             heads_num=heads_num, size_head=size_head,
                             kernel_size=kernel_size)

    wmap = lambda p, l: (l, 0, 0)          # stacked per-layer weights
    xmap = lambda p, l: (p, 0, 0)          # activation / output (per split)

    out = pl.pallas_call(
        kern,
        out_shape=jax.ShapeDtypeStruct((batch_splits, Bs * S, D), jnp.float32),
        grid=(batch_splits, n_layers),
        in_specs=[
            pl.BlockSpec((1, Bs * S, D), xmap),                  # x
            pl.BlockSpec((1, Bs, 1, S), lambda p, l: (p, 0, 0, 0)),  # mask
            pl.BlockSpec((1, D, 3 * HDh), wmap),                 # fused Wqkv (bf16)
            pl.BlockSpec((1, 1, 3 * HDh), wmap),                 # fused bqkv
            pl.BlockSpec((1, HDh, D), wmap),                     # Wo (bf16)
            pl.BlockSpec((1, 1, D), wmap),                       # bo
            pl.BlockSpec((1, 1, D), wmap),                       # ln1 gamma
            pl.BlockSpec((1, 1, D), wmap),                       # ln1 beta
            pl.BlockSpec((1, K * D, inter), wmap),               # conv1 W (im2col, bf16)
            pl.BlockSpec((1, 1, inter), wmap),                   # conv1 b
            pl.BlockSpec((1, inter, D), wmap),                   # conv2 W (bf16)
            pl.BlockSpec((1, 1, D), wmap),                       # conv2 b
            pl.BlockSpec((1, 1, D), wmap),                       # ln2 gamma
            pl.BlockSpec((1, 1, D), wmap),                       # ln2 beta
        ],
        out_specs=pl.BlockSpec((1, Bs * S, D), xmap),
        scratch_shapes=[
            pltpu.VMEM((Bs * S, D), jnp.float32),    # resident activation
            pltpu.VMEM((Bs * S, HDh), jnp.float32),  # per-head context slab
        ],
        compiler_params=pltpu.CompilerParams(
            dimension_semantics=("parallel", "arbitrary"),
            # Actual footprint is well under 1 MiB at these shapes; 16 MiB
            # leaves ample headroom and stays far below v7x's 64 MiB VMEM.
            vmem_limit_bytes=16 * 1024 * 1024),
    )(x_flat, mask4, fp["w_qkv"], fp["b_qkv"], fp["wo"], fp["bo"],
      fp["ln1_g"], fp["ln1_b"], fp["w1"], fp["b1"], fp["w2"], fp["b2"],
      fp["ln2_g"], fp["ln2_b"])
    return out.reshape(B, S, D)


# ----------------------------------------------------------------------------
# Parameter prep: logical per-head params -> stacked (L, ...) fused kernel
# params. One-time transform; 1/sqrt(size_head) folded into Q, conv1 packed
# for im2col, matmul weights cast to bf16.
# ----------------------------------------------------------------------------
def prepare_params(layer_params, size_head):
    scale = 1.0 / math.sqrt(size_head)
    acc = {k: [] for k in ("w_qkv", "b_qkv", "wo", "bo", "ln1_g", "ln1_b",
                           "w1", "b1", "w2", "b2", "ln2_g", "ln2_b")}
    for p in layer_params:
        H, D, Dh = p["wq"].shape
        wq = (p["wq"] * scale).transpose(1, 0, 2).reshape(D, H * Dh)
        wk = p["wk"].transpose(1, 0, 2).reshape(D, H * Dh)
        wv = p["wv"].transpose(1, 0, 2).reshape(D, H * Dh)
        bq = (p["bq"] * scale).reshape(1, H * Dh)
        bk = p["bk"].reshape(1, H * Dh)
        bv = p["bv"].reshape(1, H * Dh)
        acc["w_qkv"].append(jnp.concatenate([wq, wk, wv], axis=1))
        acc["b_qkv"].append(jnp.concatenate([bq, bk, bv], axis=1))
        acc["wo"].append(p["wo"].reshape(H * Dh, D))
        acc["bo"].append(p["bo"])
        acc["ln1_g"].append(p["ln1_g"]); acc["ln1_b"].append(p["ln1_b"])
        Kc, Dc, Ic = p["w1"].shape
        acc["w1"].append(p["w1"].reshape(Kc * Dc, Ic))        # im2col packing
        acc["b1"].append(p["b1"])
        acc["w2"].append(p["w2"]); acc["b2"].append(p["b2"])
        acc["ln2_g"].append(p["ln2_g"]); acc["ln2_b"].append(p["ln2_b"])

    bf16_keys = ("w_qkv", "wo", "w1", "w2")
    out = {}
    for k, v in acc.items():
        stacked = jnp.stack(v)
        out[k] = stacked.astype(jnp.bfloat16) if k in bf16_keys else stacked
    return out


# ----------------------------------------------------------------------------
# Deterministic synthetic parameter init (logical / per-head layout, f32)
# ----------------------------------------------------------------------------
def init_params(key, n_layers, D, inter, K, H, Dh):
    layers = []
    for i in range(n_layers):
        ks = jax.random.split(jax.random.fold_in(key, i), 12)
        s = 0.05
        n = lambda k, shape: s * jax.random.normal(k, shape, jnp.float32)
        layers.append(dict(
            wq=n(ks[0], (H, D, Dh)), bq=n(ks[1], (H, 1, Dh)),
            wk=n(ks[2], (H, D, Dh)), bk=n(ks[3], (H, 1, Dh)),
            wv=n(ks[4], (H, D, Dh)), bv=n(ks[5], (H, 1, Dh)),
            wo=n(ks[6], (H, Dh, D)), bo=n(ks[7], (1, D)),
            ln1_g=jnp.ones((1, D), jnp.float32),
            ln1_b=jnp.zeros((1, D), jnp.float32),
            w1=n(ks[8], (K, D, inter)), b1=n(ks[9], (1, inter)),
            w2=n(ks[10], (inter, D)), b2=n(ks[11], (1, D)),
            ln2_g=jnp.ones((1, D), jnp.float32),
            ln2_b=jnp.zeros((1, D), jnp.float32),
        ))
    return layers


# ----------------------------------------------------------------------------
# Pure-JAX f32 reference (mirrors the PyTorch forward) for a correctness check
# ----------------------------------------------------------------------------
def _layer_norm(y, g, b):
    mu = jnp.mean(y, axis=-1, keepdims=True)
    var = jnp.mean((y - mu) ** 2, axis=-1, keepdims=True)
    return (y - mu) * lax.rsqrt(var + 1e-5) * g + b


def ref_forward(x, mask, layer_params, K):
    pad = (K - 1) // 2
    S = x.shape[1]
    for p in layer_params:
        Dh = p["wq"].shape[2]
        q = jnp.einsum("bsd,hde->bhse", x, p["wq"]) + p["bq"][None]
        k = jnp.einsum("bsd,hde->bhse", x, p["wk"]) + p["bk"][None]
        v = jnp.einsum("bsd,hde->bhse", x, p["wv"]) + p["bv"][None]
        s = jnp.einsum("bhqe,bhke->bhqk", q / math.sqrt(Dh), k)
        s = s + mask[:, None, None, :]
        pr = jax.nn.softmax(s, axis=-1)
        ctx = jnp.einsum("bhqk,bhke->bhqe", pr, v)
        attn = jnp.einsum("bhqe,hed->bqd", ctx, p["wo"]) + p["bo"][None]
        y = _layer_norm(x + attn, p["ln1_g"][0], p["ln1_b"][0])

        xp = jnp.pad(y, ((0, 0), (pad, pad), (0, 0)))
        acc = sum(jnp.einsum("bsd,di->bsi", xp[:, dk:dk + S, :], p["w1"][dk])
                  for dk in range(K))
        h = jnp.maximum(acc + p["b1"][0], 0.0)
        z = jnp.einsum("bsi,id->bsd", h, p["w2"]) + p["b2"][0]
        x = _layer_norm(y + z, p["ln2_g"][0], p["ln2_b"][0])
    return x


if __name__ == "__main__":
    # Small shapes consistent with the module:
    # n_layers=2, model_size=32, inter_size=64, kernel_size=3,
    # heads_num=4, size_head=8, p=0.1 (dropout -> identity in eval)
    B, S, D = 2, 8, 32
    inter, K, H, Dh = 64, 3, 4, 8
    n_layers = 2

    key = jax.random.PRNGKey(0)
    kx, kp = jax.random.split(key)
    x = jax.random.normal(kx, (B, S, D), jnp.float32)
    attention_mask = jnp.zeros((B, S), jnp.float32).at[1, -2:].set(-1e9)

    params = init_params(kp, n_layers, D, inter, K, H, Dh)
    fused_params = prepare_params(params, Dh)

    # batch_splits=1: single grid step over the whole batch (right call on
    # single-TC v5e/v6e). Set batch_splits=2 on v7x to occupy both TCs.
    out = transformer_forward(x, attention_mask, fused_params,
                              n_layers=n_layers, heads_num=H, size_head=Dh,
                              kernel_size=K, batch_splits=1)
    out = jax.block_until_ready(out)

    ref = ref_forward(x, attention_mask, params, K)
    assert out.shape == (B, S, D)
    # bf16 MXU inputs + approx reciprocal -> relaxed (but still tight)
    # tolerance against the pure-f32 reference.
    assert jnp.allclose(out, ref, atol=2e-2, rtol=2e-2), (
        f"max abs diff {jnp.max(jnp.abs(out - ref))}")
    print("KERNEL_OK")
</pallas_src>

<mosaic_0001>
module attributes {stable_mosaic.version = 11 : i64} {
  func.func @_transformer_kernel(%arg0: i32, %arg1: i32, %arg2: memref<1x16x32xf32, #tpu.memory_space<vmem>>, %arg3: memref<1x2x1x8xf32, #tpu.memory_space<vmem>>, %arg4: memref<1x32x96xbf16, #tpu.memory_space<vmem>>, %arg5: memref<1x1x96xf32, #tpu.memory_space<vmem>>, %arg6: memref<1x32x32xbf16, #tpu.memory_space<vmem>>, %arg7: memref<1x1x32xf32, #tpu.memory_space<vmem>>, %arg8: memref<1x1x32xf32, #tpu.memory_space<vmem>>, %arg9: memref<1x1x32xf32, #tpu.memory_space<vmem>>, %arg10: memref<1x96x64xbf16, #tpu.memory_space<vmem>>, %arg11: memref<1x1x64xf32, #tpu.memory_space<vmem>>, %arg12: memref<1x64x32xbf16, #tpu.memory_space<vmem>>, %arg13: memref<1x1x32xf32, #tpu.memory_space<vmem>>, %arg14: memref<1x1x32xf32, #tpu.memory_space<vmem>>, %arg15: memref<1x1x32xf32, #tpu.memory_space<vmem>>, %arg16: memref<1x16x32xf32, #tpu.memory_space<vmem>>, %arg17: memref<16x32xf32, #tpu.memory_space<vmem>>, %arg18: memref<16x32xf32, #tpu.memory_space<vmem>>) attributes {dimension_semantics = [#tpu.dimension_semantics<parallel>, #tpu.dimension_semantics<arbitrary>], iteration_bounds = array<i64: 1, 2>, scalar_prefetch = 0 : i64, scratch_operands = 2 : i64, tpu.core_type = #tpu.core_type<tc>, window_params = [{transform_indices = @transform_0, window_bounds = array<i64: 1, 16, 32>}, {transform_indices = @transform_1, window_bounds = array<i64: 1, 2, 1, 8>}, {transform_indices = @transform_2, window_bounds = array<i64: 1, 32, 96>}, {transform_indices = @transform_3, window_bounds = array<i64: 1, 1, 96>}, {transform_indices = @transform_4, window_bounds = array<i64: 1, 32, 32>}, {transform_indices = @transform_5, window_bounds = array<i64: 1, 1, 32>}, {transform_indices = @transform_6, window_bounds = array<i64: 1, 1, 32>}, {transform_indices = @transform_7, window_bounds = array<i64: 1, 1, 32>}, {transform_indices = @transform_8, window_bounds = array<i64: 1, 96, 64>}, {transform_indices = @transform_9, window_bounds = array<i64: 1, 1, 64>}, {transform_indices = @transform_10, window_bounds = array<i64: 1, 64, 32>}, {transform_indices = @transform_11, window_bounds = array<i64: 1, 1, 32>}, {transform_indices = @transform_12, window_bounds = array<i64: 1, 1, 32>}, {transform_indices = @transform_13, window_bounds = array<i64: 1, 1, 32>}, {transform_indices = @transform_14, window_bounds = array<i64: 1, 16, 32>}]} {
    %c0_i32 = arith.constant 0 : i32
    %0 = arith.cmpi eq, %arg1, %c0_i32 : i32
    %1 = arith.extui %0 : i1 to i32
    %c0_i32_0 = arith.constant 0 : i32
    %2 = arith.cmpi ne, %1, %c0_i32_0 : i32
    scf.if %2 {
      %c0_91 = arith.constant 0 : index
      %c0_92 = arith.constant 0 : index
      %c0_93 = arith.constant 0 : index
      %241 = vector.load %arg2[%c0_91, %c0_92, %c0_93] : memref<1x16x32xf32, #tpu.memory_space<vmem>>, vector<1x16x32xf32>
      %242 = vector.shape_cast %241 : vector<1x16x32xf32> to vector<16x32xf32>
      %c0_94 = arith.constant 0 : index
      %c0_95 = arith.constant 0 : index
      %243 = vector.load %arg17[%c0_94, %c0_95] : memref<16x32xf32, #tpu.memory_space<vmem>>, vector<16x32xf32>
      tpu.vector_store %arg17[%c0_94, %c0_95], %242 {strides = array<i32>} : memref<16x32xf32, #tpu.memory_space<vmem>>, vector<16x32xf32>,
    } else {
    }
    %c0 = arith.constant 0 : index
    %c0_1 = arith.constant 0 : index
    %3 = vector.load %arg17[%c0, %c0_1] : memref<16x32xf32, #tpu.memory_space<vmem>>, vector<16x32xf32>
    %c0_2 = arith.constant 0 : index
    %c0_3 = arith.constant 0 : index
    %c0_4 = arith.constant 0 : index
    %c0_5 = arith.constant 0 : index
    %4 = vector.load %arg3[%c0_2, %c0_3, %c0_4, %c0_5] : memref<1x2x1x8xf32, #tpu.memory_space<vmem>>, vector<1x2x1x8xf32>
    %5 = vector.shape_cast %4 : vector<1x2x1x8xf32> to vector<2x1x8xf32>
    %6 = arith.truncf %3 : vector<16x32xf32> to vector<16x32xbf16>
    %c0_6 = arith.constant 0 : index
    %c0_7 = arith.constant 0 : index
    %c0_8 = arith.constant 0 : index
    %7 = vector.load %arg4[%c0_6, %c0_7, %c0_8] : memref<1x32x96xbf16, #tpu.memory_space<vmem>>, vector<1x32x96xbf16>
    %8 = vector.shape_cast %7 : vector<1x32x96xbf16> to vector<32x96xbf16>
    %cst = arith.constant dense<0.000000e+00> : vector<16x96xf32>
    %9 = tpu.matmul %6, %8, %cst {dimension_numbers = #tpu.dot_dimension_numbers<[1], [0], [0], [1], [0, 0, 1, 1], [], []>} : vector<16x32xbf16>, vector<32x96xbf16>, vector<16x96xf32> -> vector<16x96xf32>
    %c0_9 = arith.constant 0 : index
    %c0_10 = arith.constant 0 : index
    %c0_11 = arith.constant 0 : index
    %10 = vector.load %arg5[%c0_9, %c0_10, %c0_11] : memref<1x1x96xf32, #tpu.memory_space<vmem>>, vector<1x1x96xf32>
    %11 = vector.shape_cast %10 : vector<1x1x96xf32> to vector<1x96xf32>
    %12 = vector.broadcast %11 : vector<1x96xf32> to vector<16x96xf32>
    %13 = arith.addf %9, %12 : vector<16x96xf32>
    %14 = vector.extract_strided_slice %13 {offsets = [0, 0], sizes = [16, 8], strides = [1, 1]} : vector<16x96xf32> to vector<16x8xf32>
    %15 = vector.extract_strided_slice %13 {offsets = [0, 32], sizes = [16, 8], strides = [1, 1]} : vector<16x96xf32> to vector<16x8xf32>
    %16 = vector.extract_strided_slice %13 {offsets = [0, 64], sizes = [16, 8], strides = [1, 1]} : vector<16x96xf32> to vector<16x8xf32>
    %17 = vector.shape_cast %14 : vector<16x8xf32> to vector<2x8x8xf32>
    %18 = vector.shape_cast %15 : vector<16x8xf32> to vector<2x8x8xf32>
    %19 = vector.shape_cast %16 : vector<16x8xf32> to vector<2x8x8xf32>
    %20 = arith.truncf %17 : vector<2x8x8xf32> to vector<2x8x8xbf16>
    %21 = arith.truncf %18 : vector<2x8x8xf32> to vector<2x8x8xbf16>
    %cst_12 = arith.constant dense<0.000000e+00> : vector<2x8x8xf32>
    %22 = tpu.matmul %20, %21, %cst_12 {dimension_numbers = #tpu.dot_dimension_numbers<[2], [2], [1], [1], [0, 0, 0, 1, 1, 1], [0], [0]>} : vector<2x8x8xbf16>, vector<2x8x8xbf16>, vector<2x8x8xf32> -> vector<2x8x8xf32>
    %23 = vector.broadcast %5 : vector<2x1x8xf32> to vector<2x8x8xf32>
    %24 = arith.addf %22, %23 : vector<2x8x8xf32>
    %cst_13 = arith.constant dense<0xFF800000> : vector<2x8xf32>
    %25 = vector.multi_reduction <maximumf>, %24, %cst_13 [2] : vector<2x8x8xf32> to vector<2x8xf32>
    %26 = vector.shape_cast %25 : vector<2x8xf32> to vector<2x8x1xf32>
    %27 = vector.broadcast %26 : vector<2x8x1xf32> to vector<2x8x8xf32>
    %28 = arith.subf %24, %27 : vector<2x8x8xf32>
    %29 = math.exp %28 : vector<2x8x8xf32>
    %cst_14 = arith.constant dense<0.000000e+00> : vector<2x8xf32>
    %30 = vector.multi_reduction <add>, %29, %cst_14 [2] : vector<2x8x8xf32> to vector<2x8xf32>
    %31 = vector.shape_cast %30 : vector<2x8xf32> to vector<2x8x1xf32>
    %32 = tpu.reciprocal %31 {approx = true} : vector<2x8x1xf32> -> vector<2x8x1xf32>
    %33 = vector.broadcast %32 : vector<2x8x1xf32> to vector<2x8x8xf32>
    %34 = arith.mulf %29, %33 : vector<2x8x8xf32>
    %35 = arith.truncf %34 : vector<2x8x8xf32> to vector<2x8x8xbf16>
    %36 = arith.truncf %19 : vector<2x8x8xf32> to vector<2x8x8xbf16>
    %cst_15 = arith.constant dense<0.000000e+00> : vector<2x8x8xf32>
    %37 = tpu.matmul %35, %36, %cst_15 {dimension_numbers = #tpu.dot_dimension_numbers<[2], [1], [1], [2], [0, 0, 0, 1, 1, 2], [0], [0]>} : vector<2x8x8xbf16>, vector<2x8x8xbf16>, vector<2x8x8xf32> -> vector<2x8x8xf32>
    %38 = vector.shape_cast %37 : vector<2x8x8xf32> to vector<16x8xf32>
    %c0_16 = arith.constant 0 : index
    %c0_17 = arith.constant 0 : index
    %39 = vector.load %arg18[%c0_16, %c0_17] : memref<16x32xf32, #tpu.memory_space<vmem>>, vector<16x8xf32>
    tpu.vector_store %arg18[%c0_16, %c0_17], %38 {strides = array<i32>} : memref<16x32xf32, #tpu.memory_space<vmem>>, vector<16x8xf32>,
    %40 = vector.extract_strided_slice %13 {offsets = [0, 8], sizes = [16, 8], strides = [1, 1]} : vector<16x96xf32> to vector<16x8xf32>
    %41 = vector.extract_strided_slice %13 {offsets = [0, 40], sizes = [16, 8], strides = [1, 1]} : vector<16x96xf32> to vector<16x8xf32>
    %42 = vector.extract_strided_slice %13 {offsets = [0, 72], sizes = [16, 8], strides = [1, 1]} : vector<16x96xf32> to vector<16x8xf32>
    %43 = vector.shape_cast %40 : vector<16x8xf32> to vector<2x8x8xf32>
    %44 = vector.shape_cast %41 : vector<16x8xf32> to vector<2x8x8xf32>
    %45 = vector.shape_cast %42 : vector<16x8xf32> to vector<2x8x8xf32>
    %46 = arith.truncf %43 : vector<2x8x8xf32> to vector<2x8x8xbf16>
    %47 = arith.truncf %44 : vector<2x8x8xf32> to vector<2x8x8xbf16>
    %cst_18 = arith.constant dense<0.000000e+00> : vector<2x8x8xf32>
    %48 = tpu.matmul %46, %47, %cst_18 {dimension_numbers = #tpu.dot_dimension_numbers<[2], [2], [1], [1], [0, 0, 0, 1, 1, 1], [0], [0]>} : vector<2x8x8xbf16>, vector<2x8x8xbf16>, vector<2x8x8xf32> -> vector<2x8x8xf32>
    %49 = vector.broadcast %5 : vector<2x1x8xf32> to vector<2x8x8xf32>
    %50 = arith.addf %48, %49 : vector<2x8x8xf32>
    %cst_19 = arith.constant dense<0xFF800000> : vector<2x8xf32>
    %51 = vector.multi_reduction <maximumf>, %50, %cst_19 [2] : vector<2x8x8xf32> to vector<2x8xf32>
    %52 = vector.shape_cast %51 : vector<2x8xf32> to vector<2x8x1xf32>
    %53 = vector.broadcast %52 : vector<2x8x1xf32> to vector<2x8x8xf32>
    %54 = arith.subf %50, %53 : vector<2x8x8xf32>
    %55 = math.exp %54 : vector<2x8x8xf32>
    %cst_20 = arith.constant dense<0.000000e+00> : vector<2x8xf32>
    %56 = vector.multi_reduction <add>, %55, %cst_20 [2] : vector<2x8x8xf32> to vector<2x8xf32>
    %57 = vector.shape_cast %56 : vector<2x8xf32> to vector<2x8x1xf32>
    %58 = tpu.reciprocal %57 {approx = true} : vector<2x8x1xf32> -> vector<2x8x1xf32>
    %59 = vector.broadcast %58 : vector<2x8x1xf32> to vector<2x8x8xf32>
    %60 = arith.mulf %55, %59 : vector<2x8x8xf32>
    %61 = arith.truncf %60 : vector<2x8x8xf32> to vector<2x8x8xbf16>
    %62 = arith.truncf %45 : vector<2x8x8xf32> to vector<2x8x8xbf16>
    %cst_21 = arith.constant dense<0.000000e+00> : vector<2x8x8xf32>
    %63 = tpu.matmul %61, %62, %cst_21 {dimension_numbers = #tpu.dot_dimension_numbers<[2], [1], [1], [2], [0, 0, 0, 1, 1, 2], [0], [0]>} : vector<2x8x8xbf16>, vector<2x8x8xbf16>, vector<2x8x8xf32> -> vector<2x8x8xf32>
    %64 = vector.shape_cast %63 : vector<2x8x8xf32> to vector<16x8xf32>
    %c0_22 = arith.constant 0 : index
    %c8 = arith.constant 8 : index
    %65 = vector.load %arg18[%c0_22, %c8] : memref<16x32xf32, #tpu.memory_space<vmem>>, vector<16x8xf32>
    tpu.vector_store %arg18[%c0_22, %c8], %64 {strides = array<i32>} : memref<16x32xf32, #tpu.memory_space<vmem>>, vector<16x8xf32>,
    %66 = vector.extract_strided_slice %13 {offsets = [0, 16], sizes = [16, 8], strides = [1, 1]} : vector<16x96xf32> to vector<16x8xf32>
    %67 = vector.extract_strided_slice %13 {offsets = [0, 48], sizes = [16, 8], strides = [1, 1]} : vector<16x96xf32> to vector<16x8xf32>
    %68 = vector.extract_strided_slice %13 {offsets = [0, 80], sizes = [16, 8], strides = [1, 1]} : vector<16x96xf32> to vector<16x8xf32>
    %69 = vector.shape_cast %66 : vector<16x8xf32> to vector<2x8x8xf32>
    %70 = vector.shape_cast %67 : vector<16x8xf32> to vector<2x8x8xf32>
    %71 = vector.shape_cast %68 : vector<16x8xf32> to vector<2x8x8xf32>
    %72 = arith.truncf %69 : vector<2x8x8xf32> to vector<2x8x8xbf16>
    %73 = arith.truncf %70 : vector<2x8x8xf32> to vector<2x8x8xbf16>
    %cst_23 = arith.constant dense<0.000000e+00> : vector<2x8x8xf32>
    %74 = tpu.matmul %72, %73, %cst_23 {dimension_numbers = #tpu.dot_dimension_numbers<[2], [2], [1], [1], [0, 0, 0, 1, 1, 1], [0], [0]>} : vector<2x8x8xbf16>, vector<2x8x8xbf16>, vector<2x8x8xf32> -> vector<2x8x8xf32>
    %75 = vector.broadcast %5 : vector<2x1x8xf32> to vector<2x8x8xf32>
    %76 = arith.addf %74, %75 : vector<2x8x8xf32>
    %cst_24 = arith.constant dense<0xFF800000> : vector<2x8xf32>
    %77 = vector.multi_reduction <maximumf>, %76, %cst_24 [2] : vector<2x8x8xf32> to vector<2x8xf32>
    %78 = vector.shape_cast %77 : vector<2x8xf32> to vector<2x8x1xf32>
    %79 = vector.broadcast %78 : vector<2x8x1xf32> to vector<2x8x8xf32>
    %80 = arith.subf %76, %79 : vector<2x8x8xf32>
    %81 = math.exp %80 : vector<2x8x8xf32>
    %cst_25 = arith.constant dense<0.000000e+00> : vector<2x8xf32>
    %82 = vector.multi_reduction <add>, %81, %cst_25 [2] : vector<2x8x8xf32> to vector<2x8xf32>
    %83 = vector.shape_cast %82 : vector<2x8xf32> to vector<2x8x1xf32>
    %84 = tpu.reciprocal %83 {approx = true} : vector<2x8x1xf32> -> vector<2x8x1xf32>
    %85 = vector.broadcast %84 : vector<2x8x1xf32> to vector<2x8x8xf32>
    %86 = arith.mulf %81, %85 : vector<2x8x8xf32>
    %87 = arith.truncf %86 : vector<2x8x8xf32> to vector<2x8x8xbf16>
    %88 = arith.truncf %71 : vector<2x8x8xf32> to vector<2x8x8xbf16>
    %cst_26 = arith.constant dense<0.000000e+00> : vector<2x8x8xf32>
    %89 = tpu.matmul %87, %88, %cst_26 {dimension_numbers = #tpu.dot_dimension_numbers<[2], [1], [1], [2], [0, 0, 0, 1, 1, 2], [0], [0]>} : vector<2x8x8xbf16>, vector<2x8x8xbf16>, vector<2x8x8xf32> -> vector<2x8x8xf32>
    %90 = vector.shape_cast %89 : vector<2x8x8xf32> to vector<16x8xf32>
    %c0_27 = arith.constant 0 : index
    %c16 = arith.constant 16 : index
    %91 = vector.load %arg18[%c0_27, %c16] : memref<16x32xf32, #tpu.memory_space<vmem>>, vector<16x8xf32>
    tpu.vector_store %arg18[%c0_27, %c16], %90 {strides = array<i32>} : memref<16x32xf32, #tpu.memory_space<vmem>>, vector<16x8xf32>,
    %92 = vector.extract_strided_slice %13 {offsets = [0, 24], sizes = [16, 8], strides = [1, 1]} : vector<16x96xf32> to vector<16x8xf32>
    %93 = vector.extract_strided_slice %13 {offsets = [0, 56], sizes = [16, 8], strides = [1, 1]} : vector<16x96xf32> to vector<16x8xf32>
    %94 = vector.extract_strided_slice %13 {offsets = [0, 88], sizes = [16, 8], strides = [1, 1]} : vector<16x96xf32> to vector<16x8xf32>
    %95 = vector.shape_cast %92 : vector<16x8xf32> to vector<2x8x8xf32>
    %96 = vector.shape_cast %93 : vector<16x8xf32> to vector<2x8x8xf32>
    %97 = vector.shape_cast %94 : vector<16x8xf32> to vector<2x8x8xf32>
    %98 = arith.truncf %95 : vector<2x8x8xf32> to vector<2x8x8xbf16>
    %99 = arith.truncf %96 : vector<2x8x8xf32> to vector<2x8x8xbf16>
    %cst_28 = arith.constant dense<0.000000e+00> : vector<2x8x8xf32>
    %100 = tpu.matmul %98, %99, %cst_28 {dimension_numbers = #tpu.dot_dimension_numbers<[2], [2], [1], [1], [0, 0, 0, 1, 1, 1], [0], [0]>} : vector<2x8x8xbf16>, vector<2x8x8xbf16>, vector<2x8x8xf32> -> vector<2x8x8xf32>
    %101 = vector.broadcast %5 : vector<2x1x8xf32> to vector<2x8x8xf32>
    %102 = arith.addf %100, %101 : vector<2x8x8xf32>
    %cst_29 = arith.constant dense<0xFF800000> : vector<2x8xf32>
    %103 = vector.multi_reduction <maximumf>, %102, %cst_29 [2] : vector<2x8x8xf32> to vector<2x8xf32>
    %104 = vector.shape_cast %103 : vector<2x8xf32> to vector<2x8x1xf32>
    %105 = vector.broadcast %104 : vector<2x8x1xf32> to vector<2x8x8xf32>
    %106 = arith.subf %102, %105 : vector<2x8x8xf32>
    %107 = math.exp %106 : vector<2x8x8xf32>
    %cst_30 = arith.constant dense<0.000000e+00> : vector<2x8xf32>
    %108 = vector.multi_reduction <add>, %107, %cst_30 [2] : vector<2x8x8xf32> to vector<2x8xf32>
    %109 = vector.shape_cast %108 : vector<2x8xf32> to vector<2x8x1xf32>
    %110 = tpu.reciprocal %109 {approx = true} : vector<2x8x1xf32> -> vector<2x8x1xf32>
    %111 = vector.broadcast %110 : vector<2x8x1xf32> to vector<2x8x8xf32>
    %112 = arith.mulf %107, %111 : vector<2x8x8xf32>
    %113 = arith.truncf %112 : vector<2x8x8xf32> to vector<2x8x8xbf16>
    %114 = arith.truncf %97 : vector<2x8x8xf32> to vector<2x8x8xbf16>
    %cst_31 = arith.constant dense<0.000000e+00> : vector<2x8x8xf32>
    %115 = tpu.matmul %113, %114, %cst_31 {dimension_numbers = #tpu.dot_dimension_numbers<[2], [1], [1], [2], [0, 0, 0, 1, 1, 2], [0], [0]>} : vector<2x8x8xbf16>, vector<2x8x8xbf16>, vector<2x8x8xf32> -> vector<2x8x8xf32>
    %116 = vector.shape_cast %115 : vector<2x8x8xf32> to vector<16x8xf32>
    %c0_32 = arith.constant 0 : index
    %c24 = arith.constant 24 : index
    %117 = vector.load %arg18[%c0_32, %c24] : memref<16x32xf32, #tpu.memory_space<vmem>>, vector<16x8xf32>
    tpu.vector_store %arg18[%c0_32, %c24], %116 {strides = array<i32>} : memref<16x32xf32, #tpu.memory_space<vmem>>, vector<16x8xf32>,
    %c0_33 = arith.constant 0 : index
    %c0_34 = arith.constant 0 : index
    %118 = vector.load %arg18[%c0_33, %c0_34] : memref<16x32xf32, #tpu.memory_space<vmem>>, vector<16x32xf32>
    %119 = arith.truncf %118 : vector<16x32xf32> to vector<16x32xbf16>
    %c0_35 = arith.constant 0 : index
    %c0_36 = arith.constant 0 : index
    %c0_37 = arith.constant 0 : index
    %120 = vector.load %arg6[%c0_35, %c0_36, %c0_37] : memref<1x32x32xbf16, #tpu.memory_space<vmem>>, vector<1x32x32xbf16>
    %121 = vector.shape_cast %120 : vector<1x32x32xbf16> to vector<32x32xbf16>
    %cst_38 = arith.constant dense<0.000000e+00> : vector<16x32xf32>
    %122 = tpu.matmul %119, %121, %cst_38 {dimension_numbers = #tpu.dot_dimension_numbers<[1], [0], [0], [1], [0, 0, 1, 1], [], []>} : vector<16x32xbf16>, vector<32x32xbf16>, vector<16x32xf32> -> vector<16x32xf32>
    %c0_39 = arith.constant 0 : index
    %c0_40 = arith.constant 0 : index
    %c0_41 = arith.constant 0 : index
    %123 = vector.load %arg7[%c0_39, %c0_40, %c0_41] : memref<1x1x32xf32, #tpu.memory_space<vmem>>, vector<1x1x32xf32>
    %124 = vector.shape_cast %123 : vector<1x1x32xf32> to vector<1x32xf32>
    %125 = vector.broadcast %124 : vector<1x32xf32> to vector<16x32xf32>
    %126 = arith.addf %122, %125 : vector<16x32xf32>
    %127 = arith.addf %3, %126 : vector<16x32xf32>
    %cst_42 = arith.constant dense<0.000000e+00> : vector<16xf32>
    %128 = vector.multi_reduction <add>, %127, %cst_42 [1] : vector<16x32xf32> to vector<16xf32>
    %129 = vector.shape_cast %128 : vector<16xf32> to vector<16x1xf32>
    %cst_43 = arith.constant 3.200000e+01 : f32
    %130 = vector.broadcast %cst_43 : f32 to vector<16x1xf32>
    %131 = arith.divf %129, %130 : vector<16x1xf32>
    %132 = vector.broadcast %131 : vector<16x1xf32> to vector<16x32xf32>
    %133 = arith.subf %127, %132 : vector<16x32xf32>
    %134 = arith.mulf %133, %133 : vector<16x32xf32>
    %cst_44 = arith.constant dense<0.000000e+00> : vector<16xf32>
    %135 = vector.multi_reduction <add>, %134, %cst_44 [1] : vector<16x32xf32> to vector<16xf32>
    %136 = vector.shape_cast %135 : vector<16xf32> to vector<16x1xf32>
    %cst_45 = arith.constant 3.200000e+01 : f32
    %137 = vector.broadcast %cst_45 : f32 to vector<16x1xf32>
    %138 = arith.divf %136, %137 : vector<16x1xf32>
    %139 = vector.broadcast %131 : vector<16x1xf32> to vector<16x32xf32>
    %140 = arith.subf %127, %139 : vector<16x32xf32>
    %cst_46 = arith.constant 9.99999974E-6 : f32
    %141 = vector.broadcast %cst_46 : f32 to vector<16x1xf32>
    %142 = arith.addf %138, %141 : vector<16x1xf32>
    %143 = math.rsqrt %142 : vector<16x1xf32>
    %144 = vector.broadcast %143 : vector<16x1xf32> to vector<16x32xf32>
    %145 = arith.mulf %140, %144 : vector<16x32xf32>
    %c0_47 = arith.constant 0 : index
    %c0_48 = arith.constant 0 : index
    %c0_49 = arith.constant 0 : index
    %146 = vector.load %arg8[%c0_47, %c0_48, %c0_49] : memref<1x1x32xf32, #tpu.memory_space<vmem>>, vector<1x1x32xf32>
    %147 = vector.shape_cast %146 : vector<1x1x32xf32> to vector<1x32xf32>
    %148 = vector.broadcast %147 : vector<1x32xf32> to vector<16x32xf32>
    %149 = arith.mulf %145, %148 : vector<16x32xf32>
    %c0_50 = arith.constant 0 : index
    %c0_51 = arith.constant 0 : index
    %c0_52 = arith.constant 0 : index
    %150 = vector.load %arg9[%c0_50, %c0_51, %c0_52] : memref<1x1x32xf32, #tpu.memory_space<vmem>>, vector<1x1x32xf32>
    %151 = vector.shape_cast %150 : vector<1x1x32xf32> to vector<1x32xf32>
    %152 = vector.broadcast %151 : vector<1x32xf32> to vector<16x32xf32>
    %153 = arith.addf %149, %152 : vector<16x32xf32>
    %154 = tpu.iota {dimensions = array<i32: 0>} : vector<16x1xi32>
    %c8_i32 = arith.constant 8 : i32
    %c0_i32_53 = arith.constant 0 : i32
    %155 = arith.cmpi eq, %c8_i32, %c0_i32_53 : i32
    %c1_i32 = arith.constant 1 : i32
    %156 = arith.select %155, %c1_i32, %c8_i32 : i32
    %157 = vector.broadcast %156 : i32 to vector<16x1xi32>
    %158 = arith.remsi %154, %157 : vector<16x1xi32>
    %c0_i32_54 = arith.constant 0 : i32
    %159 = vector.broadcast %c0_i32_54 : i32 to vector<16x1xi32>
    %160 = arith.cmpi ne, %158, %159 : vector<16x1xi32>
    %c0_i32_55 = arith.constant 0 : i32
    %161 = vector.broadcast %c0_i32_55 : i32 to vector<16x1xi32>
    %162 = arith.cmpi slt, %158, %161 : vector<16x1xi32>
    %c0_i32_56 = arith.constant 0 : i32
    %163 = arith.cmpi slt, %156, %c0_i32_56 : i32
    %164 = vector.broadcast %163 : i1 to vector<16x1xi1>
    %165 = vector.broadcast %164 : vector<16x1xi1> to vector<16x1xi1>
    %166 = arith.xori %162, %165 : vector<16x1xi1>
    %167 = arith.andi %166, %160 : vector<16x1xi1>
    %168 = vector.broadcast %156 : i32 to vector<16x1xi32>
    %169 = arith.addi %158, %168 : vector<16x1xi32>
    %170 = arith.select %167, %169, %158 : vector<16x1xi1>, vector<16x1xi32>
    %c1_i32_57 = arith.constant 1 : i32
    %171 = tpu.dynamic_rotate %153 by %c1_i32_57 dim 0 : vector<16x32xf32>, i32 -> vector<16x32xf32>
    %c1_i32_58 = arith.constant 1 : i32
    %172 = vector.broadcast %c1_i32_58 : i32 to vector<16x1xi32>
    %173 = arith.cmpi sge, %170, %172 : vector<16x1xi32>
    %c9_i32 = arith.constant 9 : i32
    %174 = vector.broadcast %c9_i32 : i32 to vector<16x1xi32>
    %175 = arith.cmpi slt, %170, %174 : vector<16x1xi32>
    %176 = arith.andi %173, %175 : vector<16x1xi1>
    %cst_59 = arith.constant 0.000000e+00 : f32
    %177 = vector.shape_cast %176 : vector<16x1xi1> to vector<16x1xi1>
    %178 = vector.broadcast %177 : vector<16x1xi1> to vector<16x32xi1>
    %179 = vector.broadcast %cst_59 : f32 to vector<16x32xf32>
    %180 = arith.select %178, %171, %179 : vector<16x32xi1>, vector<16x32xf32>
    %c15_i32 = arith.constant 15 : i32
    %181 = tpu.dynamic_rotate %153 by %c15_i32 dim 0 : vector<16x32xf32>, i32 -> vector<16x32xf32>
    %c-1_i32 = arith.constant -1 : i32
    %182 = vector.broadcast %c-1_i32 : i32 to vector<16x1xi32>
    %183 = arith.cmpi sge, %170, %182 : vector<16x1xi32>
    %c7_i32 = arith.constant 7 : i32
    %184 = vector.broadcast %c7_i32 : i32 to vector<16x1xi32>
    %185 = arith.cmpi slt, %170, %184 : vector<16x1xi32>
    %186 = arith.andi %183, %185 : vector<16x1xi1>
    %cst_60 = arith.constant 0.000000e+00 : f32
    %187 = vector.shape_cast %186 : vector<16x1xi1> to vector<16x1xi1>
    %188 = vector.broadcast %187 : vector<16x1xi1> to vector<16x32xi1>
    %189 = vector.broadcast %cst_60 : f32 to vector<16x32xf32>
    %190 = arith.select %188, %181, %189 : vector<16x32xi1>, vector<16x32xf32>
    %191 = tpu.concatenate %180, %153, %190 in 1 : vector<16x32xf32>, vector<16x32xf32>, vector<16x32xf32> -> vector<16x96xf32>
    %192 = arith.truncf %191 : vector<16x96xf32> to vector<16x96xbf16>
    %c0_61 = arith.constant 0 : index
    %c0_62 = arith.constant 0 : index
    %c0_63 = arith.constant 0 : index
    %193 = vector.load %arg10[%c0_61, %c0_62, %c0_63] : memref<1x96x64xbf16, #tpu.memory_space<vmem>>, vector<1x96x64xbf16>
    %194 = vector.shape_cast %193 : vector<1x96x64xbf16> to vector<96x64xbf16>
    %cst_64 = arith.constant dense<0.000000e+00> : vector<16x64xf32>
    %195 = tpu.matmul %192, %194, %cst_64 {dimension_numbers = #tpu.dot_dimension_numbers<[1], [0], [0], [1], [0, 0, 1, 1], [], []>} : vector<16x96xbf16>, vector<96x64xbf16>, vector<16x64xf32> -> vector<16x64xf32>
    %c0_65 = arith.constant 0 : index
    %c0_66 = arith.constant 0 : index
    %c0_67 = arith.constant 0 : index
    %196 = vector.load %arg11[%c0_65, %c0_66, %c0_67] : memref<1x1x64xf32, #tpu.memory_space<vmem>>, vector<1x1x64xf32>
    %197 = vector.shape_cast %196 : vector<1x1x64xf32> to vector<1x64xf32>
    %198 = vector.broadcast %197 : vector<1x64xf32> to vector<16x64xf32>
    %199 = arith.addf %195, %198 : vector<16x64xf32>
    %cst_68 = arith.constant 0.000000e+00 : f32
    %200 = vector.broadcast %cst_68 : f32 to vector<16x64xf32>
    %201 = arith.maximumf %199, %200 : vector<16x64xf32>
    %202 = arith.truncf %201 : vector<16x64xf32> to vector<16x64xbf16>
    %c0_69 = arith.constant 0 : index
    %c0_70 = arith.constant 0 : index
    %c0_71 = arith.constant 0 : index
    %203 = vector.load %arg12[%c0_69, %c0_70, %c0_71] : memref<1x64x32xbf16, #tpu.memory_space<vmem>>, vector<1x64x32xbf16>
    %204 = vector.shape_cast %203 : vector<1x64x32xbf16> to vector<64x32xbf16>
    %cst_72 = arith.constant dense<0.000000e+00> : vector<16x32xf32>
    %205 = tpu.matmul %202, %204, %cst_72 {dimension_numbers = #tpu.dot_dimension_numbers<[1], [0], [0], [1], [0, 0, 1, 1], [], []>} : vector<16x64xbf16>, vector<64x32xbf16>, vector<16x32xf32> -> vector<16x32xf32>
    %c0_73 = arith.constant 0 : index
    %c0_74 = arith.constant 0 : index
    %c0_75 = arith.constant 0 : index
    %206 = vector.load %arg13[%c0_73, %c0_74, %c0_75] : memref<1x1x32xf32, #tpu.memory_space<vmem>>, vector<1x1x32xf32>
    %207 = vector.shape_cast %206 : vector<1x1x32xf32> to vector<1x32xf32>
    %208 = vector.broadcast %207 : vector<1x32xf32> to vector<16x32xf32>
    %209 = arith.addf %205, %208 : vector<16x32xf32>
    %210 = arith.addf %153, %209 : vector<16x32xf32>
    %cst_76 = arith.constant dense<0.000000e+00> : vector<16xf32>
    %211 = vector.multi_reduction <add>, %210, %cst_76 [1] : vector<16x32xf32> to vector<16xf32>
    %212 = vector.shape_cast %211 : vector<16xf32> to vector<16x1xf32>
    %cst_77 = arith.constant 3.200000e+01 : f32
    %213 = vector.broadcast %cst_77 : f32 to vector<16x1xf32>
    %214 = arith.divf %212, %213 : vector<16x1xf32>
    %215 = vector.broadcast %214 : vector<16x1xf32> to vector<16x32xf32>
    %216 = arith.subf %210, %215 : vector<16x32xf32>
    %217 = arith.mulf %216, %216 : vector<16x32xf32>
    %cst_78 = arith.constant dense<0.000000e+00> : vector<16xf32>
    %218 = vector.multi_reduction <add>, %217, %cst_78 [1] : vector<16x32xf32> to vector<16xf32>
    %219 = vector.shape_cast %218 : vector<16xf32> to vector<16x1xf32>
    %cst_79 = arith.constant 3.200000e+01 : f32
    %220 = vector.broadcast %cst_79 : f32 to vector<16x1xf32>
    %221 = arith.divf %219, %220 : vector<16x1xf32>
    %222 = vector.broadcast %214 : vector<16x1xf32> to vector<16x32xf32>
    %223 = arith.subf %210, %222 : vector<16x32xf32>
    %cst_80 = arith.constant 9.99999974E-6 : f32
    %224 = vector.broadcast %cst_80 : f32 to vector<16x1xf32>
    %225 = arith.addf %221, %224 : vector<16x1xf32>
    %226 = math.rsqrt %225 : vector<16x1xf32>
    %227 = vector.broadcast %226 : vector<16x1xf32> to vector<16x32xf32>
    %228 = arith.mulf %223, %227 : vector<16x32xf32>
    %c0_81 = arith.constant 0 : index
    %c0_82 = arith.constant 0 : index
    %c0_83 = arith.constant 0 : index
    %229 = vector.load %arg14[%c0_81, %c0_82, %c0_83] : memref<1x1x32xf32, #tpu.memory_space<vmem>>, vector<1x1x32xf32>
    %230 = vector.shape_cast %229 : vector<1x1x32xf32> to vector<1x32xf32>
    %231 = vector.broadcast %230 : vector<1x32xf32> to vector<16x32xf32>
    %232 = arith.mulf %228, %231 : vector<16x32xf32>
    %c0_84 = arith.constant 0 : index
    %c0_85 = arith.constant 0 : index
    %c0_86 = arith.constant 0 : index
    %233 = vector.load %arg15[%c0_84, %c0_85, %c0_86] : memref<1x1x32xf32, #tpu.memory_space<vmem>>, vector<1x1x32xf32>
    %234 = vector.shape_cast %233 : vector<1x1x32xf32> to vector<1x32xf32>
    %235 = vector.broadcast %234 : vector<1x32xf32> to vector<16x32xf32>
    %236 = arith.addf %232, %235 : vector<16x32xf32>
    %c0_87 = arith.constant 0 : index
    %c0_88 = arith.constant 0 : index
    %237 = vector.load %arg17[%c0_87, %c0_88] : memref<16x32xf32, #tpu.memory_space<vmem>>, vector<16x32xf32>
    tpu.vector_store %arg17[%c0_87, %c0_88], %236 {strides = array<i32>} : memref<16x32xf32, #tpu.memory_space<vmem>>, vector<16x32xf32>,
    %c1_i32_89 = arith.constant 1 : i32
    %238 = arith.cmpi eq, %arg1, %c1_i32_89 : i32
    %239 = arith.extui %238 : i1 to i32
    %c0_i32_90 = arith.constant 0 : i32
    %240 = arith.cmpi ne, %239, %c0_i32_90 : i32
    scf.if %240 {
      %c0_91 = arith.constant 0 : index
      %c0_92 = arith.constant 0 : index
      %c0_93 = arith.constant 0 : index
      %241 = vector.load %arg16[%c0_91, %c0_92, %c0_93] : memref<1x16x32xf32, #tpu.memory_space<vmem>>, vector<1x16x32xf32>
      %242 = vector.shape_cast %241 : vector<1x16x32xf32> to vector<16x32xf32>
      %243 = vector.shape_cast %236 : vector<16x32xf32> to vector<1x16x32xf32>
      tpu.vector_store %arg16[%c0_91, %c0_92, %c0_93], %243 {strides = array<i32>} : memref<1x16x32xf32, #tpu.memory_space<vmem>>, vector<1x16x32xf32>,
    } else {
    }
    return
  }
  func.func @transform_0(%arg0: i32, %arg1: i32) -> (i32, i32, i32) {
    %c0_i32 = arith.constant 0 : i32
    %c0_i32_0 = arith.constant 0 : i32
    %c0_i32_1 = arith.constant 0 : i32
    return %arg0, %c0_i32, %c0_i32_0 : i32, i32, i32
  }
  func.func @transform_1(%arg0: i32, %arg1: i32) -> (i32, i32, i32, i32) {
    %c0_i32 = arith.constant 0 : i32
    %c0_i32_0 = arith.constant 0 : i32
    %c0_i32_1 = arith.constant 0 : i32
    %c0_i32_2 = arith.constant 0 : i32
    return %arg0, %c0_i32, %c0_i32_0, %c0_i32_1 : i32, i32, i32, i32
  }
  func.func @transform_2(%arg0: i32, %arg1: i32) -> (i32, i32, i32) {
    %c0_i32 = arith.constant 0 : i32
    %c0_i32_0 = arith.constant 0 : i32
    %c0_i32_1 = arith.constant 0 : i32
    return %arg1, %c0_i32, %c0_i32_0 : i32, i32, i32
  }
  func.func @transform_3(%arg0: i32, %arg1: i32) -> (i32, i32, i32) {
    %c0_i32 = arith.constant 0 : i32
    %c0_i32_0 = arith.constant 0 : i32
    %c0_i32_1 = arith.constant 0 : i32
    return %arg1, %c0_i32, %c0_i32_0 : i32, i32, i32
  }
  func.func @transform_4(%arg0: i32, %arg1: i32) -> (i32, i32, i32) {
    %c0_i32 = arith.constant 0 : i32
    %c0_i32_0 = arith.constant 0 : i32
    %c0_i32_1 = arith.constant 0 : i32
    return %arg1, %c0_i32, %c0_i32_0 : i32, i32, i32
  }
  func.func @transform_5(%arg0: i32, %arg1: i32) -> (i32, i32, i32) {
    %c0_i32 = arith.constant 0 : i32
    %c0_i32_0 = arith.constant 0 : i32
    %c0_i32_1 = arith.constant 0 : i32
    return %arg1, %c0_i32, %c0_i32_0 : i32, i32, i32
  }
  func.func @transform_6(%arg0: i32, %arg1: i32) -> (i32, i32, i32) {
    %c0_i32 = arith.constant 0 : i32
    %c0_i32_0 = arith.constant 0 : i32
    %c0_i32_1 = arith.constant 0 : i32
    return %arg1, %c0_i32, %c0_i32_0 : i32, i32, i32
  }
  func.func @transform_7(%arg0: i32, %arg1: i32) -> (i32, i32, i32) {
    %c0_i32 = arith.constant 0 : i32
    %c0_i32_0 = arith.constant 0 : i32
    %c0_i32_1 = arith.constant 0 : i32
    return %arg1, %c0_i32, %c0_i32_0 : i32, i32, i32
  }
  func.func @transform_8(%arg0: i32, %arg1: i32) -> (i32, i32, i32) {
    %c0_i32 = arith.constant 0 : i32
    %c0_i32_0 = arith.constant 0 : i32
    %c0_i32_1 = arith.constant 0 : i32
    return %arg1, %c0_i32, %c0_i32_0 : i32, i32, i32
  }
  func.func @transform_9(%arg0: i32, %arg1: i32) -> (i32, i32, i32) {
    %c0_i32 = arith.constant 0 : i32
    %c0_i32_0 = arith.constant 0 : i32
    %c0_i32_1 = arith.constant 0 : i32
    return %arg1, %c0_i32, %c0_i32_0 : i32, i32, i32
  }
  func.func @transform_10(%arg0: i32, %arg1: i32) -> (i32, i32, i32) {
    %c0_i32 = arith.constant 0 : i32
    %c0_i32_0 = arith.constant 0 : i32
    %c0_i32_1 = arith.constant 0 : i32
    return %arg1, %c0_i32, %c0_i32_0 : i32, i32, i32
  }
  func.func @transform_11(%arg0: i32, %arg1: i32) -> (i32, i32, i32) {
    %c0_i32 = arith.constant 0 : i32
    %c0_i32_0 = arith.constant 0 : i32
    %c0_i32_1 = arith.constant 0 : i32
    return %arg1, %c0_i32, %c0_i32_0 : i32, i32, i32
  }
  func.func @transform_12(%arg0: i32, %arg1: i32) -> (i32, i32, i32) {
    %c0_i32 = arith.constant 0 : i32
    %c0_i32_0 = arith.constant 0 : i32
    %c0_i32_1 = arith.constant 0 : i32
    return %arg1, %c0_i32, %c0_i32_0 : i32, i32, i32
  }
  func.func @transform_13(%arg0: i32, %arg1: i32) -> (i32, i32, i32) {
    %c0_i32 = arith.constant 0 : i32
    %c0_i32_0 = arith.constant 0 : i32
    %c0_i32_1 = arith.constant 0 : i32
    return %arg1, %c0_i32, %c0_i32_0 : i32, i32, i32
  }
  func.func @transform_14(%arg0: i32, %arg1: i32) -> (i32, i32, i32) {
    %c0_i32 = arith.constant 0 : i32
    %c0_i32_0 = arith.constant 0 : i32
    %c0_i32_1 = arith.constant 0 : i32
    return %arg0, %c0_i32, %c0_i32_0 : i32, i32, i32
  }
}

</mosaic_0001>

<bundles_post_ra>
// kernel: tpu_custom_call.1
= control target key start
LH: loop header
LB: loop body
LE: loop exit
PB: predicated region body
PF: predicated region fallthrough
CT: control target
= control target key end

     0   :  { %s3274_s0 = inlined_call_operand.vmem [shape: f32[1,16,32], index: 0, kind: input, shape index: {}]   ;;  %s3275_s1 = inlined_call_operand.vmem [shape: f32[1,2,1,8], index: 1, kind: input, shape index: {}]   ;;  %s3276_s2 = inlined_call_operand.vmem [shape: bf16[2,32,96], index: 2, kind: input, shape index: {}]   ;;  %s3277_s3 = inlined_call_operand.vmem [shape: f32[2,1,96], index: 3, kind: input, shape index: {}]   ;;  %s3278_s4 = inlined_call_operand.vmem [shape: bf16[2,32,32], index: 4, kind: input, shape index: {}]   ;;  %s3279_s5 = inlined_call_operand.vmem [shape: f32[2,1,32], index: 5, kind: input, shape index: {}]   ;;  %s3280_s6 = inlined_call_operand.vmem [shape: f32[2,1,32], index: 6, kind: input, shape index: {}]   ;;  %s3281_s7 = inlined_call_operand.vmem [shape: f32[2,1,32], index: 7, kind: input, shape index: {}]   ;;  %s3282_s8 = inlined_call_operand.vmem [shape: bf16[2,96,64], index: 8, kind: input, shape index: {}]   ;;  %s3283_s9 = inlined_call_operand.vmem [shape: f32[2,1,64], index: 9, kind: input, shape index: {}]   ;;  %s3284_s10 = inlined_call_operand.vmem [shape: bf16[2,64,32], index: 10, kind: input, shape index: {}]   ;;  %s3285_s11 = inlined_call_operand.vmem [shape: f32[2,1,32], index: 11, kind: input, shape index: {}]   ;;  %s3286_s12 = inlined_call_operand.vmem [shape: f32[2,1,32], index: 12, kind: input, shape index: {}]   ;;  %s3287_s13 = inlined_call_operand.vmem [shape: f32[2,1,32], index: 13, kind: input, shape index: {}]   ;;  %s3288_s14 = inlined_call_operand.hbm [shape: f32[1,16,32], index: 14, kind: output, shape index: {}]  }
   0x1   :  { %3294 = sst [smem:[#allocation10_spill]] %s3274_s0 }
   0x2   :  { %3295 = sst [smem:[#allocation11_spill]] %s3275_s1 }
   0x3   :  { %3296 = sst [smem:[#allocation12_spill]] %s3276_s2 }
   0x4   :  { %3297 = sst [smem:[#allocation13_spill]] %s3278_s4 }
   0x5   :  { %3298 = sst [smem:[#allocation14_spill]] %s3288_s14 }
   0x6   :  { %19 = vsyncpa [#allocation5], 0  ;;  %s2850_s29 = smov 0   ;;  %s2852_s30 = smov 0  }
   0x7   :  { %s2854_s15 = smov 0  }
   0x8 LB: > { %3299 = sst [smem:[#allocation7_spill]] %s2750_s30  ;;  %s34_s17 = sadd.s32 1, %s2750_s30  ;;  %s2754_s15 = sphi %s2854_s15, %s25_s15   ;;  %s2750_s30 = sphi %s2852_s30, %s3325_s30   ;;  %s2746_s29 = sphi %s2850_s29, %s3324_s29  }
   0x9   : > { %3300 = sst [smem:[#allocation8_spill]] %s2754_s15  ;;  %p35_p0 = scmp.ge.s32.totalorder %s34_s17, 2 }
   0xa   : > { %p2337_p1 = scmp.ge.s32.totalorder %s2754_s15, 1  ;;  %p538_p2 = scmp.lt.s32.totalorder %s2754_s15, 3 }
   0xb   : > { %s3327_s17 = smov (%p35_p0, %s34_s17), 0 }
   0xc   : > { %3301 = sst [smem:[#allocation9_spill]] %s3327_s17  ;;  %p539_p3 = pnand %p2337_p1, %p538_p2 }
   0xd   : > { %p636_p4 = scmp.lt.s32.totalorder (!%p539_p3), %s2746_s29, 1  ;;  %s3302_s2 = sld [smem:[#allocation12_spill]] (!%p539_p3) }
   0xe   : > { %542 = sbr.rel (%p539_p3) target bundleno = 4310 (0x10d6), region = 76  ;;  %s3303_s4 = sld [smem:[#allocation13_spill]] (!%p539_p3) }
   0xf   : > { %p2345_p5 = scmp.ne.s32.totalorder (!%p539_p3), %s2746_s29, 0 }
  0x15   : > { %s2873_s18 = scalar_select %p636_p4, %s2746_s29, 1 }
  0x16   : > { %684 = sbr.rel (%p2345_p5) target bundleno = 30 (0x1e), region = 80  ;;  %s3304_s27 = sld [smem:[#allocation10_spill]] (!%p2345_p5)  ;;  %vm687_vm0 = vcmask (!%p2345_p5), 261120  }
  0x17   : > { %s2395_s19 = sshll.u32 %s2873_s18, 4  ;;  %s2588_s22 = smul.u32 48, %s2873_s18 }
  0x18   : > { %s640_s25 = scalar_lea.vmem %s3302_s2, %s2395_s19  ;;  %s2886_s28 = scalar_lea.vmem %s3303_s4, %s2395_s19 }
  0x19   : > { %s2397_s26 = sshll.u32 %s2873_s18, 5  ;;  %s2909_s4 = scalar_lea.vmem %s3282_s8, %s2588_s22 }
  0x1a   : > { %s2914_s14 = scalar_lea.vmem %s3284_s10, %s2397_s26  ;;  %s673_s0 = scalar_lea.vmem %s3285_s11, %s2873_s18 }
  0x1b   : > { %s676_s23 = scalar_lea.vmem %s3286_s12, %s2873_s18  ;;  %s679_s30 = scalar_lea.vmem %s3287_s13, %s2873_s18 }
  0x1c   : > { %v685_v0 = vld [vmem:[%s3304_s27] sm:$0xff] (!%p2345_p5)  ;;  %v686_v1 = vld [vmem:[%s3304_s27 + $0x8] sm:$0xff] (!%p2345_p5) }
  0x1d   : > { %688 = vst.msk [vmem:[#allocation2] sm:$0xff] %vm687_vm0, %v685_v0  ;;  %689 = vst.msk [vmem:[#allocation2 + $0x8] sm:$0xff] %vm687_vm0, %v686_v1 }
  0x1e PF: > { %v2648_v2 = vld [vmem:[%s640_s25] sm:$0xff]   ;;  %v2756_v3 = vmov 0.0   ;;  %v2649_v4 = vld [vmem:[%s640_s25 + $0x8] sm:$0xff]   ;;  %vm2757_vm1 = vmmov 0   ;;  %vm718_vm2 = vcmask 261120   ;;  %s3305_s25 = scalar_lea.vmem %s3277_s3, %s2873_s18  ;;  %s2758_s21 = smov 96  }
  0x1f   : > { %2448 = vmatprep.subr.bf16.mxu0 %v2756_v3  ;;  %2456 = vmatprep.subr.bf16.mxu1 %v2756_v3  ;;  %v2346_v8 = vld [vmem:[%s3305_s25] ss:$0 sm:$0xff]  ;;  %vm780_vm3 = vcmask 64512   ;;  %s3306_s20 = sld [smem:[#allocation11_spill]]  ;;  %s2759_s19 = smov 64   ;;  %vm905_vm4 = vcmask 1043456  }
  0x20   : > { %2449 = vmatpush3.bf16.msra.mxu0 %v2648_v2  ;;  %2452 = vmatprep.mubr.msk.bf16.mxu0 %vm2757_vm1, %v2756_v3  ;;  %s2760_s26 = smov 88   ;;  %s2761_s16 = smov 120   ;;  %vm1227_vm5 = vcmask 130112   ;;  %vm1458_vm6 = vcmask 195712   ;;  %vm1689_vm7 = vcmask 261312   ;;  %vm1888_vm14 = vcmask 523264  }
  0x21   : > { %2450 = vmatprep.subr.bf16.mxu0 %v2756_v3  ;;  %2458 = vmatprep.mubr.msk.bf16.mxu1 %vm2757_vm1, %v2756_v3  ;;  %s2762_s1 = smov 56   ;;  %s2763_s2 = smov 80   ;;  %vm1947_vm15 = vcmask 785408  }
  0x22   : > { %s2764_s25 = smov 112   ;;  %s2766_s17 = smov 72  }
  0x23   : > { %s2767_s15 = smov 104   ;;  %s2768_s24 = smov 40  }
  0x24   : > { %v2939_v5 = vld [vmem:[#allocation2] sm:$0xff]  ;;  %v2941_v6 = vld [vmem:[#allocation2 + $0x8] sm:$0xff]  ;;  %2451 = vmatpush3.bf16.msra.mxu0 %v2649_v4  ;;  %s2769_s22 = smov 8   ;;  %p2390_p6 = scmp.ne.s32.totalorder %s2746_s29, 1 }
  0x25   : > { %v694_v7 = vpack.c.bf16 %v2941_v6, %v2939_v5  ;;  %2462 = vmatprep.subr.bf16.mxu0 %v2756_v3  ;;  %v2978_v21 = vld [vmem:[%s3306_s20] ss:$0 sm:$0xff]  ;;  %v2984_v26 = vld [vmem:[%s3306_s20 + $0x1] ss:$0 sm:$0xff] }
  0x27   : > { %2453 = vmatmul.mubr.msk.bf16.vlgmr.msra.gmra.mrb[0].mxu0 %vm718_vm2, %v694_v7 }
  0x28   : > { %2464 = vmatprep.mubr.msk.bf16.mxu0 %vm2757_vm1, %v2756_v3 }
  0xfa   : > { %v756_v9 = vpop.f32.mrb[0].mxu0 }
  0xfb   : > { %v757_v10 = vadd.f32 %v2346_v8, %v756_v9  ;;  %v2454_v11 = vpop.f32.mrb[1].mxu0 }
  0xfc   : > { %v759_v12 = vpop.f32.mrb[2].mxu0 }
  0xfd   : > { %v2957_v13 = vpack.c.bf16 %v757_v10, %v757_v10  ;;  %v760_v14 = vadd.f32 %v2346_v8, %v759_v12  ;;  %v2455_v15 = vpop.f32.mrb[3].mxu0 }
  0xff   : > { %778 = vrot.lane.b32.xlu0 %v2957_v13, %s2758_s21  ;;  %v2960_v16 = vpack.c.bf16 %v760_v14, %v760_v14 }
 0x103   : > { %828 = vrot.lane.b32.xlu0 %v2960_v16, %s2758_s21  ;;  %s2765_s21 = smov 48  }
 0x171   : > { %v779_v17 = vpop.permute.xlu0 %778 }
 0x172   : > { %v785_v18 = vsel %vm780_vm3, %v779_v17, 0 }
 0x173   : > { %2457 = vmatpush3.bf16.xpose.msra.mxu1 %v785_v18 }
 0x174   : > { %2468 = vmatprep.subr.bf16.mxu1 %v2756_v3 }
 0x175   : > { %v829_v19 = vpop.permute.xlu0 %828 }
 0x176   : > { %v834_v20 = vsel %vm780_vm3, %v829_v19, 0 }
 0x177   : > { %2463 = vmatpush3.bf16.xpose.msra.mxu0 %v834_v20 }
 0x178   : > { %2474 = vmatprep.subr.bf16.mxu0 %v2756_v3 }
 0x17a   : > { %2459 = vmatmul.mubr.msk.bf16.vlgmr.msra.gmra.mrb[0].mxu1 %vm780_vm3, %v2957_v13 }
 0x17b   : > { %2470 = vmatprep.mubr.msk.bf16.mxu1 %vm2757_vm1, %v2756_v3 }
 0x17e   : > { %2465 = vmatmul.mubr.msk.bf16.vlgmr.msra.gmra.mrb[4].mxu0 %vm780_vm3, %v2960_v16 }
 0x17f   : > { %2476 = vmatprep.mubr.msk.bf16.mxu0 %vm2757_vm1, %v2756_v3 }
 0x24d   : > { %v821_v22 = vpop.f32.mrb[0].mxu1 }
 0x24e   : > { %v822_v23 = vadd.f32 %v2978_v21, %v821_v22  ;;  %v2460_v24 = vpop.f32.mrb[1].mxu1 }
 0x24f   : > { %v824_v25 = vpop.f32.mrb[2].mxu1 }
 0x250   : > { %v2461_v27 = vpop.f32.mrb[3].mxu1  ;;  %v876_v28 = vsel %vm780_vm3, %v822_v23, -inf }
 0x251   : > { %877 = vmax.xlane.f32.xlu1 %v876_v28  ;;  %v870_v29 = vpop.f32.mrb[4].mxu0 }
 0x252   : > { %v871_v30 = vadd.f32 %v2984_v26, %v870_v29  ;;  %v2466_v31 = vpop.f32.mrb[5].mxu0 }
 0x253   : > { %v873_v32 = vpop.f32.mrb[6].mxu0 }
 0x254   : > { %v2467_v33 = vpop.f32.mrb[7].mxu0  ;;  %v879_v34 = vsel %vm780_vm3, %v871_v30, -inf }
 0x255   : > { %880 = vmax.xlane.f32.xlu1 %v879_v34 }
 0x266   : > { %900 = vrot.lane.b32.xlu1 %v2957_v13, %s2759_s19 }
 0x26a   : > { %949 = vrot.lane.b32.xlu1 %v2960_v16, %s2759_s19 }
 0x26e   : > { %1001 = vrot.lane.b32.xlu1 %v2957_v13, %s2760_s26 }
 0x2de   : > { %v878_v35 = vpop.xlane.xlu1 %877 }
 0x2df   : > { %v882_v36 = vsub.f32 %v822_v23, %v878_v35 }
 0x2e1   : > { %v884_v37 = vmul.f32 1.442695, %v882_v36 }
 0x2e2   : > { %v881_v38 = vpop.xlane.xlu1 %880 }
 0x2e3   : > { %2662 = vpow2.f32 %v884_v37  ;;  %v883_v39 = vsub.f32 %v871_v30, %v881_v38 }
 0x2e5   : > { %v886_v40 = vmul.f32 1.442695, %v883_v39 }
 0x2e6   : > { %v901_v41 = vpop.permute.xlu1 %900 }
 0x2e7   : > { %2664 = vpow2.f32 %v886_v40  ;;  %v907_v42 = vsel %vm905_vm4, %v901_v41, 0 }
 0x2e8   : > { %2469 = vmatpush3.bf16.msra.mxu1 %v907_v42 }
 0x2e9   : > { %2480 = vmatprep.subr.bf16.mxu1 %v2756_v3 }
 0x2ea   : > { %v950_v43 = vpop.permute.xlu1 %949 }
 0x2eb   : > { %v955_v44 = vsel %vm905_vm4, %v950_v43, 0 }
 0x2ec   : > { %2475 = vmatpush3.bf16.msra.mxu0 %v955_v44 }
 0x2ed   : > { %v2663_v45 = vpop.eup %2662  ;;  %2486 = vmatprep.subr.bf16.mxu0 %v2756_v3 }
 0x2ee   : > { %v888_v46 = vsel %vm780_vm3, %v2663_v45, 0.0  ;;  %v1002_v49 = vpop.permute.xlu1 %1001 }
 0x2ef   : > { %889 = vadd.xlane.f32.xlu0 %v888_v46  ;;  %v1007_v56 = vsel %vm780_vm3, %v1002_v49, 0 }
 0x2f1   : > { %v2665_v47 = vpop.eup %2664 }
 0x2f2   : > { %v891_v48 = vsel %vm780_vm3, %v2665_v47, 0.0 }
 0x2f3   : > { %892 = vadd.xlane.f32.xlu1 %v891_v48 }
 0x304   : > { %1051 = vrot.lane.b32.xlu1 %v2960_v16, %s2760_s26  ;;  %s2770_s26 = smov 16  }
 0x305   : > { %999 = vrot.lane.b32.xlu0 %v2957_v13, %s2761_s16 }
 0x308   : > { %1049 = vrot.lane.b32.xlu1 %v2960_v16, %s2761_s16  ;;  %s2771_s16 = smov 24  }
 0x37c   : > { %v890_v50 = vpop.xlane.xlu0 %889 }
 0x37d   : > { %2666 = vrcp.f32 %v890_v50 }
 0x380   : > { %v893_v51 = vpop.xlane.xlu1 %892  ;;  %v1000_v61 = vpop.permute.xlu0 %999 }
 0x381   : > { %2668 = vrcp.f32 %v893_v51 }
 0x384   : > { %v1052_v58 = vpop.permute.xlu1 %1051 }
 0x385   : > { %v1057_v60 = vsel %vm780_vm3, %v1052_v58, 0 }
 0x387   : > { %v2667_v52 = vpop.eup %2666 }
 0x388   : > { %v896_v53 = vmul.f32 %v2667_v52, %v2663_v45  ;;  %v1050_v62 = vpop.permute.xlu1 %1049 }
 0x38a   : > { %v898_v54 = vpack.c.bf16 %v896_v53, %v896_v53 }
 0x38b   : > { %v2669_v55 = vpop.eup %2668 }
 0x38c   : > { %v897_v57 = vmul.f32 %v2669_v55, %v2665_v47  ;;  %2471 = vmatmul.mubr.msk.bf16.vlgmr.msra.gmra.mrb[4].mxu1 %vm780_vm3, %v898_v54 }
 0x38d   : > { %2481 = vmatpush3.bf16.xpose.msra.mxu1 %v1007_v56  ;;  %2482 = vmatprep.mubr.msk.bf16.mxu1 %vm2757_vm1, %v2756_v3 }
 0x38e   : > { %v899_v59 = vpack.c.bf16 %v897_v57, %v897_v57  ;;  %2492 = vmatprep.subr.bf16.mxu1 %v2756_v3 }
 0x390   : > { %2477 = vmatmul.mubr.msk.bf16.vlgmr.msra.gmra.mrb[8].mxu0 %vm780_vm3, %v899_v59 }
 0x391   : > { %2487 = vmatpush3.bf16.xpose.msra.mxu0 %v1057_v60  ;;  %2488 = vmatprep.mubr.msk.bf16.mxu0 %vm2757_vm1, %v2756_v3 }
 0x392   : > { %2498 = vmatprep.subr.bf16.mxu0 %v2756_v3 }
 0x394   : > { %2483 = vmatmul.mubr.msk.bf16.vlgmr.msra.gmra.mrb[8].mxu1 %vm780_vm3, %v1000_v61 }
 0x395   : > { %2494 = vmatprep.mubr.msk.bf16.mxu1 %vm2757_vm1, %v2756_v3 }
 0x398   : > { %2489 = vmatmul.mubr.msk.bf16.vlgmr.msra.gmra.mrb[12].mxu0 %vm780_vm3, %v1050_v62 }
 0x399   : > { %2500 = vmatprep.mubr.msk.bf16.mxu0 %vm2757_vm1, %v2756_v3 }
 0x45f   : > { %v943_v63 = vpop.f32.mrb[4].mxu1 }
 0x460   : > { %997 = vst.msk [vmem:[#allocation3] sm:$0xff] %vm780_vm3, %v943_v63  ;;  %v2472_v0 = vpop.f32.mrb[5].mxu1 }
 0x461   : > { %v946_v1 = vpop.f32.mrb[6].mxu1 }
 0x462   : > { %v2473_v2 = vpop.f32.mrb[7].mxu1 }
 0x463   : > { %v991_v4 = vpop.f32.mrb[8].mxu0 }
 0x464   : > { %998 = vst.msk [vmem:[#allocation3 + $0x8] sm:$0xff] %vm780_vm3, %v991_v4  ;;  %v2478_v7 = vpop.f32.mrb[9].mxu0 }
 0x465   : > { %v994_v8 = vpop.f32.mrb[10].mxu0 }
 0x466   : > { %v2479_v9 = vpop.f32.mrb[11].mxu0 }
 0x467   : > { %v1043_v10 = vpop.f32.mrb[8].mxu1 }
 0x468   : > { %v1044_v11 = vadd.f32 %v2978_v21, %v1043_v10  ;;  %v2484_v12 = vpop.f32.mrb[9].mxu1 }
 0x469   : > { %v1046_v14 = vpop.f32.mrb[10].mxu1 }
 0x46a   : > { %v2485_v15 = vpop.f32.mrb[11].mxu1  ;;  %v1099_v17 = vsel %vm780_vm3, %v1044_v11, -inf }
 0x46b   : > { %1100 = vmax.xlane.f32.xlu1 %v1099_v17  ;;  %v1093_v18 = vpop.f32.mrb[12].mxu0 }
 0x46c   : > { %v1094_v19 = vadd.f32 %v2984_v26, %v1093_v18  ;;  %v2490_v20 = vpop.f32.mrb[13].mxu0 }
 0x46d   : > { %v1096_v22 = vpop.f32.mrb[14].mxu0 }
 0x46e   : > { %v2491_v23 = vpop.f32.mrb[15].mxu0  ;;  %v1102_v24 = vsel %vm780_vm3, %v1094_v19, -inf }
 0x46f   : > { %1103 = vmax.xlane.f32.xlu0 %v1102_v24 }
 0x47c   : > { %1123 = vrot.lane.b32.xlu1 %v2957_v13, %s2762_s1 }
 0x480   : > { %1232 = vrot.lane.b32.xlu1 %v2957_v13, %s2763_s2 }
 0x485   : > { %1171 = vrot.lane.b32.xlu0 %v2960_v16, %s2762_s1 }
 0x489   : > { %1230 = vrot.lane.b32.xlu0 %v2957_v13, %s2764_s25 }
 0x4f8   : > { %v1101_v25 = vpop.xlane.xlu1 %1100 }
 0x4f9   : > { %v1105_v27 = vsub.f32 %v1044_v11, %v1101_v25 }
 0x4fb   : > { %v1107_v28 = vmul.f32 1.442695, %v1105_v27 }
 0x4fc   : > { %v1124_v29 = vpop.permute.xlu1 %1123  ;;  %v1104_v30 = vpop.xlane.xlu0 %1103 }
 0x4fd   : > { %2670 = vpow2.f32 %v1107_v28  ;;  %v1129_v31 = vsel %vm905_vm4, %v1124_v29, 0  ;;  %v1106_v32 = vsub.f32 %v1094_v19, %v1104_v30 }
 0x4fe   : > { %2493 = vmatpush3.bf16.msra.mxu1 %v1129_v31 }
 0x4ff   : > { %v1109_v33 = vmul.f32 1.442695, %v1106_v32  ;;  %2504 = vmatprep.subr.bf16.mxu1 %v2756_v3 }
 0x500   : > { %v1172_v34 = vpop.permute.xlu0 %1171  ;;  %v1233_v40 = vpop.permute.xlu1 %1232 }
 0x501   : > { %2672 = vpow2.f32 %v1109_v33  ;;  %v1177_v35 = vsel %vm905_vm4, %v1172_v34, 0  ;;  %v1238_v47 = vsel %vm780_vm3, %v1233_v40, 0 }
 0x502   : > { %2499 = vmatpush3.bf16.msra.mxu0 %v1177_v35 }
 0x503   : > { %2510 = vmatprep.subr.bf16.mxu0 %v2756_v3 }
 0x504   : > { %v1231_v52 = vpop.permute.xlu0 %1230 }
 0x507   : > { %v2671_v36 = vpop.eup %2670 }
 0x508   : > { %v1111_v37 = vsel %vm780_vm3, %v2671_v36, 0.0 }
 0x509   : > { %1112 = vadd.xlane.f32.xlu1 %v1111_v37 }
 0x50b   : > { %v2673_v38 = vpop.eup %2672 }
 0x50c   : > { %v1114_v39 = vsel %vm780_vm3, %v2673_v38, 0.0 }
 0x50d   : > { %1115 = vadd.xlane.f32.xlu1 %v1114_v39 }
 0x51e   : > { %1282 = vrot.lane.b32.xlu1 %v2960_v16, %s2763_s2  ;;  %s3307_s2 = scalar_lea.vmem %s3279_s5, %s2873_s18 }
 0x522   : > { %1280 = vrot.lane.b32.xlu1 %v2960_v16, %s2764_s25 }
 0x596   : > { %v1113_v41 = vpop.xlane.xlu1 %1112 }
 0x597   : > { %2674 = vrcp.f32 %v1113_v41 }
 0x59a   : > { %v1116_v42 = vpop.xlane.xlu1 %1115 }
 0x59b   : > { %2676 = vrcp.f32 %v1116_v42 }
 0x59e   : > { %v1283_v49 = vpop.permute.xlu1 %1282 }
 0x59f   : > { %v1288_v51 = vsel %vm780_vm3, %v1283_v49, 0 }
 0x5a1   : > { %v2675_v43 = vpop.eup %2674 }
 0x5a2   : > { %v1119_v44 = vmul.f32 %v2675_v43, %v2671_v36  ;;  %v1281_v53 = vpop.permute.xlu1 %1280 }
 0x5a4   : > { %v1121_v45 = vpack.c.bf16 %v1119_v44, %v1119_v44 }
 0x5a5   : > { %v2677_v46 = vpop.eup %2676 }
 0x5a6   : > { %v1120_v48 = vmul.f32 %v2677_v46, %v2673_v38  ;;  %2495 = vmatmul.mubr.msk.bf16.vlgmr.msra.gmra.mrb[12].mxu1 %vm780_vm3, %v1121_v45 }
 0x5a7   : > { %2505 = vmatpush3.bf16.xpose.msra.mxu1 %v1238_v47  ;;  %2506 = vmatprep.mubr.msk.bf16.mxu1 %vm2757_vm1, %v2756_v3 }
 0x5a8   : > { %v1122_v50 = vpack.c.bf16 %v1120_v48, %v1120_v48  ;;  %2516 = vmatprep.subr.bf16.mxu1 %v2756_v3 }
 0x5aa   : > { %2501 = vmatmul.mubr.msk.bf16.vlgmr.msra.gmra.mrb[16].mxu0 %vm780_vm3, %v1122_v50 }
 0x5ab   : > { %2511 = vmatpush3.bf16.xpose.msra.mxu0 %v1288_v51  ;;  %2512 = vmatprep.mubr.msk.bf16.mxu0 %vm2757_vm1, %v2756_v3 }
 0x5ac   : > { %2522 = vmatprep.subr.bf16.mxu0 %v2756_v3 }
 0x5ae   : > { %2507 = vmatmul.mubr.msk.bf16.vlgmr.msra.gmra.mrb[16].mxu1 %vm780_vm3, %v1231_v52 }
 0x5af   : > { %2518 = vmatprep.mubr.msk.bf16.mxu1 %vm2757_vm1, %v2756_v3 }
 0x5b2   : > { %2513 = vmatmul.mubr.msk.bf16.vlgmr.msra.gmra.mrb[20].mxu0 %vm780_vm3, %v1281_v53 }
 0x5b3   : > { %2524 = vmatprep.mubr.msk.bf16.mxu0 %vm2757_vm1, %v2756_v3 }
 0x679   : > { %v3053_v54 = vpop.f32.mrb[12].mxu1 }
 0x67a   : > { %v2496_v55 = vpop.f32.mrb[13].mxu1 }
 0x67b   : > { %v1168_v56 = vpop.f32.mrb[14].mxu1 }
 0x67c   : > { %v2497_v57 = vpop.f32.mrb[15].mxu1 }
 0x67d   : > { %v3055_v58 = vpop.f32.mrb[16].mxu0 }
 0x67e   : > { %v2502_v59 = vpop.f32.mrb[17].mxu0 }
 0x67f   : > { %v1216_v60 = vpop.f32.mrb[18].mxu0 }
 0x680   : > { %v2503_v61 = vpop.f32.mrb[19].mxu0 }
 0x681   : > { %v1274_v62 = vpop.f32.mrb[16].mxu1 }
 0x682   : > { %v1275_v63 = vadd.f32 %v2978_v21, %v1274_v62  ;;  %v2508_v0 = vpop.f32.mrb[17].mxu1 }
 0x683   : > { %v1277_v1 = vpop.f32.mrb[18].mxu1 }
 0x684   : > { %v2509_v2 = vpop.f32.mrb[19].mxu1  ;;  %v1330_v4 = vsel %vm780_vm3, %v1275_v63, -inf }
 0x685   : > { %1331 = vmax.xlane.f32.xlu0 %v1330_v4  ;;  %v1324_v7 = vpop.f32.mrb[20].mxu0 }
 0x686   : > { %v1325_v8 = vadd.f32 %v2984_v26, %v1324_v7  ;;  %v2514_v9 = vpop.f32.mrb[21].mxu0 }
 0x687   : > { %v1327_v10 = vpop.f32.mrb[22].mxu0 }
 0x688   : > { %v2515_v11 = vpop.f32.mrb[23].mxu0  ;;  %v1333_v12 = vsel %vm780_vm3, %v1325_v8, -inf }
 0x689   : > { %1334 = vmax.xlane.f32.xlu1 %v1333_v12 }
 0x69a   : > { %1354 = vrot.lane.b32.xlu1 %v2957_v13, %s2765_s21 }
 0x69e   : > { %1463 = vrot.lane.b32.xlu1 %v2957_v13, %s2766_s17 }
 0x6a2   : > { %1513 = vrot.lane.b32.xlu1 %v2960_v16, %s2766_s17  ;;  %s3308_s17 = scalar_lea.vmem %s3280_s6, %s2873_s18 }
 0x6a6   : > { %1511 = vrot.lane.b32.xlu1 %v2960_v16, %s2767_s15 }
 0x712   : > { %v1332_v14 = vpop.xlane.xlu0 %1331 }
 0x713   : > { %v1336_v15 = vsub.f32 %v1275_v63, %v1332_v14 }
 0x715   : > { %v1338_v17 = vmul.f32 1.442695, %v1336_v15 }
 0x716   : > { %v1335_v18 = vpop.xlane.xlu1 %1334 }
 0x717   : > { %2678 = vpow2.f32 %v1338_v17  ;;  %v1337_v19 = vsub.f32 %v1325_v8, %v1335_v18 }
 0x719   : > { %v1340_v20 = vmul.f32 1.442695, %v1337_v19 }
 0x71a   : > { %v1355_v22 = vpop.permute.xlu1 %1354 }
 0x71b   : > { %2680 = vpow2.f32 %v1340_v20  ;;  %v1360_v23 = vsel %vm905_vm4, %v1355_v22, 0 }
 0x71c   : > { %2517 = vmatpush3.bf16.msra.mxu1 %v1360_v23 }
 0x71d   : > { %2528 = vmatprep.subr.bf16.mxu1 %v2756_v3 }
 0x71e   : > { %v1464_v34 = vpop.permute.xlu1 %1463 }
 0x71f   : > { %v1469_v38 = vsel %vm780_vm3, %v1464_v34, 0 }
 0x721   : > { %v2679_v24 = vpop.eup %2678 }
 0x722   : > { %v1342_v25 = vsel %vm780_vm3, %v2679_v24, 0.0  ;;  %v1514_v40 = vpop.permute.xlu1 %1513 }
 0x723   : > { %1343 = vadd.xlane.f32.xlu0 %v1342_v25  ;;  %v1519_v42 = vsel %vm780_vm3, %v1514_v40, 0 }
 0x725   : > { %v2681_v27 = vpop.eup %2680 }
 0x726   : > { %v1345_v28 = vsel %vm780_vm3, %v2681_v27, 0.0  ;;  %v1512_v44 = vpop.permute.xlu1 %1511 }
 0x727   : > { %1346 = vadd.xlane.f32.xlu0 %v1345_v28 }
 0x73d   : > { %1402 = vrot.lane.b32.xlu0 %v2960_v16, %s2765_s21 }
 0x741   : > { %1461 = vrot.lane.b32.xlu0 %v2957_v13, %s2767_s15 }
 0x7b0   : > { %v1344_v29 = vpop.xlane.xlu0 %1343 }
 0x7b1   : > { %2682 = vrcp.f32 %v1344_v29 }
 0x7b4   : > { %v1347_v30 = vpop.xlane.xlu0 %1346 }
 0x7b5   : > { %2684 = vrcp.f32 %v1347_v30  ;;  %v2650_v30 = vld [vmem:[%s2886_s28] sm:$0xff]  }
 0x7b8   : > { %v1403_v31 = vpop.permute.xlu0 %1402 }
 0x7b9   : > { %v1408_v32 = vsel %vm905_vm4, %v1403_v31, 0  ;;  %v2651_v31 = vld [vmem:[%s2886_s28 + $0x8] sm:$0xff]   ;;  %s3318_s28 = scalar_lea.vmem %s3283_s9, %s2873_s18 }
 0x7ba   : > { %2523 = vmatpush3.bf16.msra.mxu0 %v1408_v32 }
 0x7bb   : > { %v2683_v33 = vpop.eup %2682  ;;  %2534 = vmatprep.subr.bf16.mxu0 %v2756_v3 }
 0x7bc   : > { %v1350_v35 = vmul.f32 %v2683_v33, %v2679_v24  ;;  %v1462_v43 = vpop.permute.xlu0 %1461 }
 0x7be   : > { %v1352_v36 = vpack.c.bf16 %v1350_v35, %v1350_v35 }
 0x7bf   : > { %v2685_v37 = vpop.eup %2684 }
 0x7c0   : > { %v1351_v39 = vmul.f32 %v2685_v37, %v2681_v27  ;;  %2519 = vmatmul.mubr.msk.bf16.vlgmr.msra.gmra.mrb[20].mxu1 %vm780_vm3, %v1352_v36 }
 0x7c1   : > { %2529 = vmatpush3.bf16.xpose.msra.mxu1 %v1469_v38  ;;  %2530 = vmatprep.mubr.msk.bf16.mxu1 %vm2757_vm1, %v2756_v3 }
 0x7c2   : > { %v1353_v41 = vpack.c.bf16 %v1351_v39, %v1351_v39  ;;  %2540 = vmatprep.subr.bf16.mxu1 %v2756_v3 }
 0x7c4   : > { %2525 = vmatmul.mubr.msk.bf16.vlgmr.msra.gmra.mrb[24].mxu0 %vm780_vm3, %v1353_v41 }
 0x7c5   : > { %2535 = vmatpush3.bf16.xpose.msra.mxu0 %v1519_v42  ;;  %2536 = vmatprep.mubr.msk.bf16.mxu0 %vm2757_vm1, %v2756_v3 }
 0x7c6   : > { %2546 = vmatprep.subr.bf16.mxu0 %v2756_v3 }
 0x7c8   : > { %2531 = vmatmul.mubr.msk.bf16.vlgmr.msra.gmra.mrb[24].mxu1 %vm780_vm3, %v1462_v43 }
 0x7c9   : > { %2542 = vmatprep.mubr.msk.bf16.mxu1 %vm2757_vm1, %v2756_v3 }
 0x7cc   : > { %2537 = vmatmul.mubr.msk.bf16.vlgmr.msra.gmra.mrb[28].mxu0 %vm780_vm3, %v1512_v44 }
 0x7cd   : > { %2548 = vmatprep.mubr.msk.bf16.mxu0 %vm2757_vm1, %v2756_v3 }
 0x893   : > { %v1396_v45 = vpop.f32.mrb[20].mxu1 }
 0x894   : > { %v2520_v46 = vpop.f32.mrb[21].mxu1 }
 0x895   : > { %v1399_v47 = vpop.f32.mrb[22].mxu1 }
 0x896   : > { %v2521_v48 = vpop.f32.mrb[23].mxu1 }
 0x897   : > { %v1444_v49 = vpop.f32.mrb[24].mxu0 }
 0x898   : > { %v2526_v50 = vpop.f32.mrb[25].mxu0 }
 0x899   : > { %v1447_v51 = vpop.f32.mrb[26].mxu0 }
 0x89a   : > { %v2527_v52 = vpop.f32.mrb[27].mxu0 }
 0x89b   : > { %v1505_v53 = vpop.f32.mrb[24].mxu1 }
 0x89c   : > { %v1506_v55 = vadd.f32 %v2978_v21, %v1505_v53  ;;  %v2532_v56 = vpop.f32.mrb[25].mxu1 }
 0x89d   : > { %v1508_v57 = vpop.f32.mrb[26].mxu1 }
 0x89e   : > { %v2533_v59 = vpop.f32.mrb[27].mxu1  ;;  %v1561_v60 = vsel %vm780_vm3, %v1506_v55, -inf }
 0x89f   : > { %1562 = vmax.xlane.f32.xlu0 %v1561_v60  ;;  %v1555_v61 = vpop.f32.mrb[28].mxu0 }
 0x8a0   : > { %v1556_v62 = vadd.f32 %v2984_v26, %v1555_v61  ;;  %v2538_v63 = vpop.f32.mrb[29].mxu0 }
 0x8a1   : > { %v1558_v0 = vpop.f32.mrb[30].mxu0 }
 0x8a2   : > { %v2539_v1 = vpop.f32.mrb[31].mxu0  ;;  %v1564_v2 = vsel %vm780_vm3, %v1556_v62, -inf }
 0x8a3   : > { %1565 = vmax.xlane.f32.xlu1 %v1564_v2  ;;  %v2652_v2 = vld [vmem:[%s2909_s4] sm:$0xff]  }
 0x8b4   : > { %1585 = vrot.lane.b32.xlu1 %v2957_v13, %s2768_s24 }
 0x8b8   : > { %1221 = vrot.lane.b32.xlu1 %v3053_v54, %s2769_s22 }
 0x8bc   : > { %1223 = vrot.lane.b32.xlu1 %v3055_v58, %s2769_s22 }
 0x8c0   : > { %1454 = vrot.lane.b32.xlu1 %v1444_v49, %s2770_s26 }
 0x92c   : > { %v1563_v21 = vpop.xlane.xlu0 %1562 }
 0x92d   : > { %v1567_v26 = vsub.f32 %v1506_v55, %v1563_v21  ;;  %v2653_v21 = vld [vmem:[%s2909_s4 + $0x8] sm:$0xff]  }
 0x92f   : > { %v1569_v4 = vmul.f32 1.442695, %v1567_v26  ;;  %v2654_v26 = vld [vmem:[%s2909_s4 + $0x10] sm:$0xff]  }
 0x930   : > { %v1566_v7 = vpop.xlane.xlu1 %1565 }
 0x931   : > { %2686 = vpow2.f32 %v1569_v4  ;;  %v1568_v8 = vsub.f32 %v1556_v62, %v1566_v7  ;;  %v2655_v4 = vld [vmem:[%s2909_s4 + $0x18] sm:$0xff]  }
 0x933   : > { %v1571_v9 = vmul.f32 1.442695, %v1568_v8 }
 0x934   : > { %v1586_v10 = vpop.permute.xlu1 %1585 }
 0x935   : > { %2688 = vpow2.f32 %v1571_v9  ;;  %v1591_v13 = vsel %vm905_vm4, %v1586_v10, 0 }
 0x936   : > { %2541 = vmatpush3.bf16.msra.mxu1 %v1591_v13 }
 0x937   : > { %2552 = vmatprep.subr.bf16.mxu1 %v2756_v3 }
 0x938   : > { %v1222_v54 = vpop.permute.xlu1 %1221 }
 0x939   : > { %1228 = vst.msk [vmem:[#allocation3] sm:$0xff] %vm1227_vm5, %v1222_v54 }
 0x93b   : > { %v2687_v58 = vpop.eup %2686 }
 0x93c   : > { %v1224_v11 = vpop.permute.xlu1 %1223  ;;  %v1573_v12 = vsel %vm780_vm3, %v2687_v58, 0.0 }
 0x93d   : > { %1229 = vst.msk [vmem:[#allocation3 + $0x8] sm:$0xff] %vm1227_vm5, %v1224_v11  ;;  %1574 = vadd.xlane.f32.xlu0 %v1573_v12 }
 0x93f   : > { %v2689_v14 = vpop.eup %2688 }
 0x940   : > { %v1455_v15 = vpop.permute.xlu1 %1454  ;;  %v1576_v17 = vsel %vm780_vm3, %v2689_v14, 0.0 }
 0x941   : > { %1460 = vst.msk [vmem:[#allocation3 + $0x8] sm:$0xff] %vm1458_vm6, %v1455_v15  ;;  %1577 = vadd.xlane.f32.xlu0 %v1576_v17  ;;  %v2656_v17 = vld [vmem:[%s2909_s4 + $0x20] sm:$0xff]  }
 0x957   : > { %1633 = vrot.lane.b32.xlu0 %v2960_v16, %s2768_s24 }
 0x95b   : > { %1452 = vrot.lane.b32.xlu0 %v1396_v45, %s2770_s26  ;;  %v2368_v45 = vld [vmem:[%s3307_s2] ss:$0 sm:$0xff]  ;;  %s3309_s26 = scalar_lea.vmem %s3281_s7, %s2873_s18 }
 0x9ca   : > { %v1575_v18 = vpop.xlane.xlu0 %1574 }
 0x9cb   : > { %2690 = vrcp.f32 %v1575_v18 }
 0x9ce   : > { %v1578_v19 = vpop.xlane.xlu0 %1577 }
 0x9cf   : > { %2692 = vrcp.f32 %v1578_v19 }
 0x9d2   : > { %v1634_v20 = vpop.permute.xlu0 %1633 }
 0x9d3   : > { %v1639_v22 = vsel %vm905_vm4, %v1634_v20, 0  ;;  %v2373_v20 = vld [vmem:[%s3309_s26] ss:$0 sm:$0xff] }
 0x9d4   : > { %2547 = vmatpush3.bf16.msra.mxu0 %v1639_v22 }
 0x9d5   : > { %v2691_v23 = vpop.eup %2690  ;;  %2560 = vmatprep.subr.bf16.mxu0 %v2756_v3 }
 0x9d6   : > { %v1581_v24 = vmul.f32 %v2691_v23, %v2687_v58  ;;  %v1453_v25 = vpop.permute.xlu0 %1452  ;;  %v1809_v58 = vlaneseq }
 0x9d7   : > { %1459 = vst.msk [vmem:[#allocation3] sm:$0xff] %vm1458_vm6, %v1453_v25  ;;  %v2657_v25 = vld [vmem:[%s2909_s4 + $0x28] sm:$0xff]   ;;  %s2772_s4 = smov 32  }
 0x9d8   : > { %v1583_v27 = vpack.c.bf16 %v1581_v24, %v1581_v24  ;;  %v1810_v11 = vshrl.u32 %v1809_v58, 7 }
 0x9d9   : > { %v2693_v16 = vpop.eup %2692 }
 0x9da   : > { %v1582_v28 = vmul.f32 %v2693_v16, %v2689_v14  ;;  %2543 = vmatmul.mubr.msk.bf16.vlgmr.msra.gmra.mrb[28].mxu1 %vm780_vm3, %v1583_v27  ;;  %v2372_v14 = vld [vmem:[%s3308_s17] ss:$0 sm:$0xff]  ;;  %v1811_v18 = vadd.s32 8, %v1810_v11  ;;  %v1816_v24 = vand.u32 7, %v1810_v11  ;;  %vm1855_vm8 = vcmp.lt.s32.totalorder %v1810_v11, 7 }
 0x9db   : > { %2556 = vmatprep.mubr.msk.bf16.mxu1 %vm2757_vm1, %v2756_v3  ;;  %2553 = vmatpush3.bf16.msra.mxu1 %v2650_v30  ;;  %vm1838_vm10 = vcmp.lt.s32.totalorder %v1810_v11, 1 }
 0x9dc   : > { %v1584_v29 = vpack.c.bf16 %v1582_v28, %v1582_v28  ;;  %2554 = vmatprep.subr.bf16.mxu1 %v2756_v3  ;;  %v1823_v16 = vand.u32 7, %v1811_v18  ;;  %vm3158_vm9 = vcmp.lt.s32.totalorder %v1816_v24, 7  ;;  %vm3168_vm12 = vcmp.ge.s32.totalorder %v1816_v24, 1 }
 0x9de   : > { %2549 = vmatmul.mubr.msk.bf16.vlgmr.msra.gmra.mrb[32].mxu0 %vm780_vm3, %v1584_v29  ;;  %vm3164_vm11 = vcmp.lt.s32.totalorder %v1823_v16, 7  ;;  %vm3172_vm13 = vcmp.ge.s32.totalorder %v1823_v16, 1 }
 0x9df   : > { %2572 = vmatprep.mubr.msk.bf16.mxu0 %vm2757_vm1, %v2756_v3  ;;  %2555 = vmatpush3.bf16.msra.mxu1 %v2651_v31  ;;  %v2658_v31 = vld [vmem:[%s2914_s14] sm:$0xff]  }
 0x9e0   : > { %2576 = vmatprep.subr.bf16.mxu1 %v2756_v3  ;;  %2561 = vmatpush3.bf16.msra.mxu0 %v2652_v2 }
 0x9e1   : > { %2562 = vmatprep.subr.bf16.mxu0 %v2756_v3 }
 0x9e4   : > { %2563 = vmatpush3.bf16.msra.mxu0 %v2653_v21 }
 0x9e5   : > { %2564 = vmatprep.subr.bf16.mxu0 %v2756_v3 }
 0x9e8   : > { %2565 = vmatpush3.bf16.msra.mxu0 %v2654_v26 }
 0x9e9   : > { %2566 = vmatprep.subr.bf16.mxu0 %v2756_v3 }
 0x9ec   : > { %2567 = vmatpush3.bf16.msra.mxu0 %v2655_v4 }
 0x9ed   : > { %2568 = vmatprep.subr.bf16.mxu0 %v2756_v3 }
 0x9f0   : > { %2569 = vmatpush3.bf16.msra.mxu0 %v2656_v17 }
 0x9f1   : > { %2570 = vmatprep.subr.bf16.mxu0 %v2756_v3 }
 0x9f4   : > { %2571 = vmatpush3.bf16.msra.mxu0 %v2657_v25 }
 0xaad   : > { %v1627_v32 = vpop.f32.mrb[28].mxu1 }
 0xaae   : > { %1683 = vrot.lane.b32.xlu0 %v1627_v32, %s2771_s16  ;;  %v2544_v33 = vpop.f32.mrb[29].mxu1 }
 0xaaf   : > { %v1630_v34 = vpop.f32.mrb[30].mxu1 }
 0xab0   : > { %v2545_v35 = vpop.f32.mrb[31].mxu1 }
 0xab1   : > { %v1675_v36 = vpop.f32.mrb[32].mxu0 }
 0xab2   : > { %1685 = vrot.lane.b32.xlu1 %v1675_v36, %s2771_s16  ;;  %v2550_v37 = vpop.f32.mrb[33].mxu0 }
 0xab3   : > { %v1678_v38 = vpop.f32.mrb[34].mxu0 }
 0xab4   : > { %v2551_v39 = vpop.f32.mrb[35].mxu0 }
 0xb20   : > { %v1684_v40 = vpop.permute.xlu0 %1683 }
 0xb21   : > { %1690 = vst.msk [vmem:[#allocation3] sm:$0xff] %vm1689_vm7, %v1684_v40  ;;  %v2659_v40 = vld [vmem:[%s2914_s14 + $0x8] sm:$0xff]  }
 0xb24   : > { %v1686_v41 = vpop.permute.xlu1 %1685 }
 0xb25   : > { %1691 = vst.msk [vmem:[#allocation3 + $0x8] sm:$0xff] %vm1689_vm7, %v1686_v41 }
 0xb28   : > { %v1692_v42 = vld [vmem:[#allocation3] sm:$0xff] }
 0xb2c   : > { %v1693_v43 = vld [vmem:[#allocation3 + $0x8] sm:$0xff] }
 0xb2d   : > { %v1694_v44 = vpack.c.bf16 %v1693_v43, %v1692_v42 }
 0xb2f   : > { %2557 = vmatmul.mubr.msk.bf16.vlgmr.msra.gmra.mrb[32].mxu1 %vm718_vm2, %v1694_v44 }
 0xb30   : > { %2584 = vmatprep.mubr.msk.bf16.mxu1 %vm2757_vm1, %v2756_v3  ;;  %2577 = vmatpush3.bf16.msra.mxu1 %v2658_v31 }
 0xb31   : > { %2578 = vmatprep.subr.bf16.mxu1 %v2756_v3 }
 0xb34   : > { %2579 = vmatpush3.bf16.msra.mxu1 %v2659_v40  ;;  %v2389_v40 = vld [vmem:[%s679_s30] ss:$0 sm:$0xff] }
 0xb35   : > { %2580 = vmatprep.subr.bf16.mxu1 %v2756_v3 }
 0xc02   : > { %v1755_v46 = vpop.f32.mrb[32].mxu1 }
 0xc03   : > { %v1756_v47 = vadd.f32 %v2368_v45, %v1755_v46  ;;  %v2558_v48 = vpop.f32.mrb[33].mxu1 }
 0xc04   : > { %v1758_v49 = vpop.f32.mrb[34].mxu1 }
 0xc05   : > { %v1759_v50 = vadd.f32 %v2368_v45, %v1758_v49  ;;  %v2559_v51 = vpop.f32.mrb[35].mxu1  ;;  %v1762_v52 = vadd.f32 %v1756_v47, %v2939_v5 }
 0xc07   : > { %v1764_v53 = vsel %vm718_vm2, %v1762_v52, 0.0  ;;  %v1763_v55 = vadd.f32 %v1759_v50, %v2941_v6 }
 0xc08   : > { %1765 = vadd.xlane.f32.xlu0 %v1764_v53 }
 0xc09   : > { %v1767_v56 = vsel %vm718_vm2, %v1763_v55, 0.0 }
 0xc0a   : > { %1768 = vadd.xlane.f32.xlu1 %v1767_v56 }
 0xc95   : > { %v1766_v57 = vpop.xlane.xlu0 %1765 }
 0xc96   : > { %v1771_v59 = vmul.f32 0.03125, %v1766_v57 }
 0xc97   : > { %v1769_v60 = vpop.xlane.xlu1 %1768 }
 0xc98   : > { %v1773_v61 = vsub.f32 %v1762_v52, %v1771_v59  ;;  %v1772_v62 = vmul.f32 0.03125, %v1769_v60 }
 0xc9a   : > { %v1774_v63 = vsub.f32 %v1763_v55, %v1772_v62  ;;  %v1775_v0 = vmul.f32 %v1773_v61, %v1773_v61 }
 0xc9c   : > { %v1777_v5 = vsel %vm718_vm2, %v1775_v0, 0.0  ;;  %v1776_v1 = vmul.f32 %v1774_v63, %v1774_v63  ;;  %v2661_v0 = vld [vmem:[%s2914_s14 + $0x18] sm:$0xff]  }
 0xc9d   : > { %1778 = vadd.xlane.f32.xlu0 %v1777_v5  ;;  %v2374_v5 = vld [vmem:[%s3318_s28] ss:$0 sm:$0xff] }
 0xc9e   : > { %v1780_v6 = vsel %vm718_vm2, %v1776_v1, 0.0 }
 0xca1   : > { %1781 = vadd.xlane.f32.xlu0 %v1780_v6 }
 0xd2a   : > { %v1779_v7 = vpop.xlane.xlu0 %1778 }
 0xd2b   : > { %v1783_v8 = vmul.f32 0.03125, %v1779_v7 }
 0xd2d   : > { %v1785_v9 = vadd.f32 1e-05, %v1783_v8 }
 0xd2e   : > { %v1782_v10 = vpop.xlane.xlu0 %1781 }
 0xd2f   : > { %2694 = vrsqrt.f32 %v1785_v9  ;;  %v1784_v13 = vmul.f32 0.03125, %v1782_v10 }
 0xd31   : > { %v1786_v54 = vadd.f32 1e-05, %v1784_v13 }
 0xd33   : > { %2696 = vrsqrt.f32 %v1786_v54 }
 0xd39   : > { %v2695_v12 = vpop.eup %2694 }
 0xd3a   : > { %v1789_v15 = vmul.f32 %v2695_v12, %v1773_v61 }
 0xd3c   : > { %v1798_v19 = vmul.f32 %v2372_v14, %v1789_v15 }
 0xd3d   : > { %v2697_v22 = vpop.eup %2696 }
 0xd3e   : > { %v1790_v23 = vmul.f32 %v2697_v22, %v1774_v63  ;;  %v3154_v27 = vadd.f32 %v2373_v20, %v1798_v19  ;;  %v2660_v63 = vld [vmem:[%s2914_s14 + $0x10] sm:$0xff]  }
 0xd3f   : > { %2581 = vmatpush3.bf16.msra.mxu1 %v2660_v63 }
 0xd40   : > { %v1799_v28 = vmul.f32 %v2372_v14, %v1790_v23  ;;  %v1853_v32 = vrot.slane %v3154_v27, 1  ;;  %v1836_v38 = vrot.slane %v3154_v27, 7  ;;  %2582 = vmatprep.subr.bf16.mxu1 %v2756_v3  ;;  %v2382_v3 = vld [vmem:[%s673_s0] ss:$0 sm:$0xff] }
 0xd42   : > { %v3156_v29 = vadd.f32 %v2373_v20, %v1799_v28 }
 0xd43   : > { %2583 = vmatpush3.bf16.msra.mxu1 %v2661_v0 }
 0xd44   : > { %v2638_v36 = vpack.i.bf16 %v3156_v29, %v3154_v27  ;;  %v1854_v37 = vrot.slane %v3156_v29, 1  ;;  %v1837_v39 = vrot.slane %v3156_v29, 7 }
 0xd46   : > { %2639 = vrot.lane.b32.xlu1 %v2638_v36, %s2772_s4  ;;  %v1856_v41 = vsel %vm1855_vm8, %v1853_v32, %v1854_v37  ;;  %v1857_v42 = vsel %vm1855_vm8, %v1854_v37, %v1853_v32  ;;  %v1839_v43 = vsel %vm1838_vm10, %v1836_v38, %v1837_v39  ;;  %v1840_v44 = vsel %vm1838_vm10, %v1837_v39, %v1836_v38  ;;  %v2388_v37 = vld [vmem:[%s676_s23] ss:$0 sm:$0xff] }
 0xd47   : > { %v1868_v45 = vsel %vm3158_vm9, %v1856_v41, 0.0  ;;  %v1869_v46 = vsel %vm3164_vm11, %v1857_v42, 0.0  ;;  %v1851_v47 = vsel %vm3168_vm12, %v1840_v44, 0.0  ;;  %v1852_v48 = vsel %vm3172_vm13, %v1839_v43, 0.0 }
 0xd48   : > { %v2643_v49 = vpack.i.bf16 %v1869_v46, %v1868_v45 }
 0xd4a   : > { %2644 = vrot.lane.b32.xlu0 %v2643_v49, %s2759_s19 }
 0xdb8   : > { %v2640_v50 = vpop.permute.xlu1 %2639 }
 0xdb9   : > { %v2642_v51 = vunpack.i.h.bf16 %v2640_v50  ;;  %v2641_v52 = vunpack.i.l.bf16 %v2640_v50 }
 0xdbb   : > { %v1886_v57 = vsel %vm718_vm2, %v1851_v47, %v2641_v52  ;;  %v1887_v59 = vsel %vm718_vm2, %v1852_v48, %v2642_v51 }
 0xdbc   : > { %v2645_v53 = vpop.permute.xlu0 %2644 }
 0xdbd   : > { %v2647_v55 = vunpack.i.h.bf16 %v2645_v53  ;;  %v2646_v56 = vunpack.i.l.bf16 %v2645_v53 }
 0xdbf   : > { %v1889_v60 = vsel %vm1888_vm14, %v1886_v57, %v2646_v56  ;;  %v1890_v61 = vsel %vm1888_vm14, %v1887_v59, %v2647_v55 }
 0xdc0   : > { %v1891_v62 = vpack.c.bf16 %v1890_v61, %v1889_v60 }
 0xdc2   : > { %2573 = vmatmul.mubr.msk.bf16.vlgmr.msra.gmra.mrb[36].mxu0 %vm1947_vm15, %v1891_v62 }
 0xe95   : > { %v1985_v1 = vpop.f32.mrb[36].mxu0 }
 0xe96   : > { %v1986_v6 = vadd.f32 %v2374_v5, %v1985_v1  ;;  %v2574_v2 = vpop.f32.mrb[37].mxu0 }
 0xe97   : > { %v1988_v21 = vpop.f32.mrb[38].mxu0 }
 0xe98   : > { %v1989_v26 = vadd.f32 %v2374_v5, %v1988_v21  ;;  %v2575_v4 = vpop.f32.mrb[39].mxu0  ;;  %v1992_v7 = vmax.f32 %v1986_v6, 0.0 }
 0xe9a   : > { %v1993_v8 = vmax.f32 %v1989_v26, 0.0 }
 0xe9c   : > { %v1994_v9 = vpack.c.bf16 %v1993_v8, %v1992_v7 }
 0xe9e   : > { %2585 = vmatmul.mubr.msk.bf16.vlgmr.msra.gmra.mrb[36].mxu1 %vm1888_vm14, %v1994_v9 }
 0xf71   : > { %v2071_v10 = vpop.f32.mrb[36].mxu1 }
 0xf72   : > { %v2072_v13 = vadd.f32 %v2382_v3, %v2071_v10  ;;  %v2586_v54 = vpop.f32.mrb[37].mxu1 }
 0xf73   : > { %v2074_v58 = vpop.f32.mrb[38].mxu1 }
 0xf74   : > { %v2075_v11 = vadd.f32 %v2382_v3, %v2074_v58  ;;  %v2587_v12 = vpop.f32.mrb[39].mxu1  ;;  %v2078_v14 = vadd.f32 %v2072_v13, %v3154_v27 }
 0xf76   : > { %v2080_v15 = vsel %vm718_vm2, %v2078_v14, 0.0  ;;  %v2079_v17 = vadd.f32 %v2075_v11, %v3156_v29 }
 0xf77   : > { %2081 = vadd.xlane.f32.xlu1 %v2080_v15 }
 0xf78   : > { %v2083_v18 = vsel %vm718_vm2, %v2079_v17, 0.0 }
 0xf79   : > { %2084 = vadd.xlane.f32.xlu0 %v2083_v18 }
0x1004   : > { %v2082_v19 = vpop.xlane.xlu1 %2081 }
0x1005   : > { %v2086_v20 = vmul.f32 0.03125, %v2082_v19 }
0x1006   : > { %v2085_v22 = vpop.xlane.xlu0 %2084 }
0x1007   : > { %v2088_v23 = vsub.f32 %v2078_v14, %v2086_v20  ;;  %v2087_v24 = vmul.f32 0.03125, %v2085_v22 }
0x1009   : > { %v2089_v25 = vsub.f32 %v2079_v17, %v2087_v24  ;;  %v2090_v16 = vmul.f32 %v2088_v23, %v2088_v23 }
0x100b   : > { %v2092_v28 = vsel %vm718_vm2, %v2090_v16, 0.0  ;;  %v2091_v30 = vmul.f32 %v2089_v25, %v2089_v25 }
0x100c   : > { %2093 = vadd.xlane.f32.xlu1 %v2092_v28 }
0x100d   : > { %v2095_v27 = vsel %vm718_vm2, %v2091_v30, 0.0 }
0x100e   : > { %2096 = vadd.xlane.f32.xlu0 %v2095_v27 }
0x1099   : > { %v2094_v29 = vpop.xlane.xlu1 %2093 }
0x109a   : > { %v2098_v31 = vmul.f32 0.03125, %v2094_v29 }
0x109b   : > { %v2097_v32 = vpop.xlane.xlu0 %2096 }
0x109c   : > { %v2100_v33 = vadd.f32 1e-05, %v2098_v31  ;;  %v2099_v34 = vmul.f32 0.03125, %v2097_v32 }
0x109e   : > { %2698 = vrsqrt.f32 %v2100_v33  ;;  %v2101_v35 = vadd.f32 1e-05, %v2099_v34 }
0x10a0   : > { %2700 = vrsqrt.f32 %v2101_v35 }
0x10a8   : > { %v2699_v36 = vpop.eup %2698 }
0x10a9   : > { %v2104_v38 = vmul.f32 %v2699_v36, %v2088_v23 }
0x10aa   : > { %v2701_v39 = vpop.eup %2700 }
0x10ab   : > { %v2113_v41 = vmul.f32 %v2388_v37, %v2104_v38  ;;  %v2105_v42 = vmul.f32 %v2701_v39, %v2089_v25  ;;  %2129 = sbr.rel (%p2390_p6) target bundleno = 4274 (0x10b2), region = 84 }
0x10ad   : > { %v2122_v43 = vadd.f32 %v2389_v40, %v2113_v41  ;;  %v2114_v44 = vmul.f32 %v2388_v37, %v2105_v42 }
0x10af   : > { %2124 = vst.msk [vmem:[#allocation2] sm:$0xff] %vm718_vm2, %v2122_v43  ;;  %v2123_v45 = vadd.f32 %v2389_v40, %v2114_v44  ;;  %2130 = vst.msk [vmem:[#allocation4] sm:$0xff] (!%p2390_p6), %vm718_vm2, %v2122_v43 }
0x10b1   : > { %2125 = vst.msk [vmem:[#allocation2 + $0x8] sm:$0xff] %vm718_vm2, %v2123_v45  ;;  %2131 = vst.msk [vmem:[#allocation4 + $0x8] sm:$0xff] (!%p2390_p6), %vm718_vm2, %v2123_v45 }
0x10b2 PF: > { %s3319_s23 = sld [smem:[#allocation8_spill]]  ;;  %s2773_s17 = smov [#allocation4]  }
0x10b3   : > { %s2141_s15 = sshll.u32 %s2773_s17, 4  ;;  %s2142_s15 = int_to_ptr.vmem [resolvable:$true] %s2141_s15 }
0x10b4   : > { %s2702_s24 = scalar_lea.vmem %s2142_s15, 256  ;;  %p2709_p11 = scmp.lt.s32.totalorder %s2142_s15, %s2142_s15 }
0x10b5   : > { %p2703_p8 = scmp.ne.s32.totalorder %s2142_s15, %s2702_s24  ;;  %p2710_p12 = scmp.lt.s32.totalorder %s2702_s24, %s2702_s24 }
0x10b7   : > { %p2711_p13 = por %p2710_p12, %p2709_p11 }
0x10b8   : > { %s3320_s18 = sadd.s32 4294967295, %s3319_s23  }
0x10b9   : > { %p3238_p7 = scmp.eq.s32.totalorder %s3320_s18, 1 }
0x10bb   : > { %p2704_p9 = pnand %p2703_p8, %p3238_p7 }
0x10bd   : > { %p2705_p10 = pneg %p2704_p9 }
0x10bf   : > { %p2712_p0 = pnand %p2711_p13, %p2705_p10 }
0x10c1   : > { %2715 = shalt.err (!%p2712_p0)
}
0x10c2   : > { %s3322_s4 = sld [smem:[#allocation14_spill]] }
0x10c8   : > { %s2716_s19 = scalar_lea.hbm %s3322_s4, 256 }
0x10c9   : > { %p2717_p1 = scmp.ne.s32.totalorder %s3322_s4, %s2716_s19  ;;  %p2722_p4 = scmp.lt.u32.totalorder %s2716_s19, %s3322_s4 }
0x10cb   : > { %p2718_p2 = pnand %p2717_p1, %p3238_p7 }
0x10cd   : > { %p2719_p3 = pneg %p2718_p2 }
0x10cf   : > { %p2724_p5 = pnand %p2722_p4, %p2719_p3 }
0x10d1   : > { %2727 = shalt.err (!%p2724_p5)
}
0x10d2   : > { %s2774_s14 = smov 128  }
0x10d3   : > { %2590 = dma.vmem_to_hbm [thread:$0]  (%p3238_p7), %s2142_s15, 256, %s3322_s4, [#allocation5], %s2774_s14, %s2774_s14, %s2769_s22  }
0x10d4   : > { %2741 = dma.done.wait (%p3238_p7), [#allocation5], 256  }
0x10d5   : > { %2743 = vsyncadd (%p3238_p7), [#allocation5], 4294967040 }
0x10d6 PF: > { %s3323_s21 = sld [smem:[#allocation8_spill]]  ;;  %s3324_s29 = sld [smem:[#allocation7_spill]] }
0x10d7   : > { %s3325_s30 = sld [smem:[#allocation9_spill]] }
0x10dc   : > { %s25_s15 = sadd.s32 1, %s3323_s21  }
0x10dd   : > { %p22_p6 = scmp.ge.s32.totalorder %s25_s15, 4  }
0x10df   :  { %24 = sbr.rel (!%p22_p6) target bundleno = 8 (0x8), region = 151 }
0x10e6   :  { %2157 = vsyncpa [#allocation5], 1 }
0x10e7   :  { %2159 = vsyncpa [#allocation5 + $0x1], 1 }

</bundles_post_ra>
